<compile_context>
chip_gen: v5e
topology: v5e:2x2
jax: 0.10.0
libtpu: 0.0.40
codegen_flags: <defaults>
</compile_context>

<pallas_src>
import math

import jax
import jax.numpy as jnp
import numpy as np
from jax.experimental import pallas as pl
from jax.experimental.pallas import tpu as pltpu


# ----------------------------------------------------------------------------
# Pallas kernel: one grid step == TB batch samples, fully vectorized over (TB, S, D).
# ----------------------------------------------------------------------------
def _dkmax_kernel(pr_ref, pt_ref, x_ref, out_ref):
    TB, S, D = x_ref.shape
    K = out_ref.shape[1]                      # padded output rows (multiple of 8)
    base = pl.program_id(0) * TB              # first sample index of this block

    x = x_ref[...]                            # (TB, S, D)
    b_iota = jax.lax.broadcasted_iota(jnp.int32, (TB, S, D), 0)
    s_iota = jax.lax.broadcasted_iota(jnp.int32, (TB, S, D), 1)

    # --- broadcast per-sample SMEM scalars (pool_range) into a full valid mask -------
    valid = (b_iota == 0) & (s_iota < pr_ref[base + 0])
    for t in range(1, TB):
        valid = valid | ((b_iota == t) & (s_iota < pr_ref[base + t]))

    # --- rank each element within its column (chunked pairwise over comparing rows) --
    # cnt[b,s,d] = #{ s' valid : x[b,s',d] > x[b,s,d]  or  (== and s' < s) }
    CH = min(8, S)
    cnt = jnp.zeros((TB, S, D), jnp.int32)
    c = x[:, None, :, :]                      # (TB, 1, S, D)  value at s
    ss = s_iota[:, None, :, :]                # (TB, 1, S, D)  index s
    for c0 in range(0, S, CH):
        a = x[:, c0:c0 + CH, :][:, :, None, :]        # (TB, CH, 1, D)  value at s'
        va = valid[:, c0:c0 + CH, :][:, :, None, :]   # (TB, CH, 1, D)
        sp = s_iota[:, c0:c0 + CH, :][:, :, None, :]  # (TB, CH, 1, D)  index s'
        beats = va & ((a > c) | ((a == c) & (sp < ss)))   # (TB, CH, S, D)
        cnt = cnt + jnp.sum(beats.astype(jnp.int32), axis=1)

    # element kept iff it is among the pool_target largest of its column
    keep = (b_iota == 0) & (cnt < pt_ref[base + 0])
    for t in range(1, TB):
        keep = keep | ((b_iota == t) & (cnt < pt_ref[base + t]))
    selected = valid & keep                   # (TB, S, D)

    x_sel = jnp.where(selected, x, jnp.zeros_like(x))

    # --- order-preserving compaction ---------------------------------------------------
    # output row of a selected element = # selected elements at earlier time steps.
    # Computed as a chunked exclusive prefix-sum (intra-chunk pairwise over only CH rows
    # + running inter-chunk offset), then a one-hot placement sum per chunk.
    running = jnp.zeros((TB, 1, D), jnp.int32)           # selected count before this chunk
    out_acc = jnp.zeros((TB, K, D), x.dtype)
    for c0 in range(0, S, CH):
        sel_c = selected[:, c0:c0 + CH, :]               # (TB, CH, D)
        sel_ci = sel_c.astype(jnp.int32)
        x_c = x_sel[:, c0:c0 + CH, :]                    # (TB, CH, D)

        # intra-chunk exclusive prefix sum along time
        spq = jax.lax.broadcasted_iota(jnp.int32, (TB, CH, CH, D), 1)   # s' within chunk
        ssq = jax.lax.broadcasted_iota(jnp.int32, (TB, CH, CH, D), 2)   # s  within chunk
        earlier = jnp.where(spq < ssq, sel_ci[:, :, None, :], 0)        # (TB, CH, CH, D)
        excl = jnp.sum(earlier, axis=1)                  # (TB, CH, D)

        pos_c = excl + running                           # global output row
        running = running + jnp.sum(sel_ci, axis=1, keepdims=True)
        pos_c = jnp.where(sel_c, pos_c, K)               # unselected -> out of range

        r_idx = jax.lax.broadcasted_iota(jnp.int32, (TB, CH, K, D), 2)
        place = pos_c[:, :, None, :] == r_idx            # (TB, CH, K, D)
        contrib = jnp.where(place, x_c[:, :, None, :], 0.0)
        out_acc = out_acc + jnp.sum(contrib, axis=1)     # (TB, K, D)

    out_ref[...] = out_acc.astype(out_ref.dtype)         # rows >= k stay exactly 0


# ----------------------------------------------------------------------------
# Wrapper: host-side scalar bookkeeping (pool_target arithmetic, padding);
# the k-max selection runs in the kernel.
# ----------------------------------------------------------------------------
def dynamic_max_pool(x, lengths, layer, total_layers, pool_ranges, top_k, *, batch_tile=None):
    x = jnp.asarray(x)
    B, S, D = x.shape

    lengths_np = np.asarray(lengths)
    frac = (total_layers - layer) / total_layers
    pool_targets = [max(top_k, math.ceil(frac * int(l))) for l in lengths_np]
    K_true = int(max(pool_targets))
    K_pad = ((max(K_true, 1) + 7) // 8) * 8              # multiple of 8 -> unmasked vst

    # Batch tile: >= 2 grid steps when B >= 2 so both v7x TensorCores get work.
    if batch_tile is None:
        batch_tile = max(1, min(8, (B + 1) // 2))
    tb = int(batch_tile)
    n_steps = (B + tb - 1) // tb
    B_pad = n_steps * tb

    pr = np.zeros((B_pad,), np.int32)
    pr[:B] = np.asarray(pool_ranges, np.int32)           # padded samples: range 0 -> all zeros
    pt = np.zeros((B_pad,), np.int32)
    pt[:B] = np.asarray(pool_targets, np.int32)
    pr = jnp.asarray(pr)
    pt = jnp.asarray(pt)

    if B_pad != B:
        x = jnp.concatenate([x, jnp.zeros((B_pad - B, S, D), x.dtype)], axis=0)

    grid_spec = pltpu.PrefetchScalarGridSpec(
        num_scalar_prefetch=2,
        grid=(n_steps,),
        in_specs=[pl.BlockSpec((tb, S, D), lambda g, pr_ref, pt_ref: (g, 0, 0))],
        out_specs=pl.BlockSpec((tb, K_pad, D), lambda g, pr_ref, pt_ref: (g, 0, 0)),
    )

    out = pl.pallas_call(
        _dkmax_kernel,
        out_shape=jax.ShapeDtypeStruct((B_pad, K_pad, D), x.dtype),
        grid_spec=grid_spec,
        compiler_params=pltpu.CompilerParams(
            dimension_semantics=("parallel",),
            vmem_limit_bytes=32 * 1024 * 1024,
        ),
    )(pr, pt, x)

    out = out[:B, :K_true]                               # drop batch/row padding
    pool_result_ranges = [int(t) for t in pool_targets]
    return out, pool_result_ranges


# ----------------------------------------------------------------------------
# Pure numpy reference (mirrors the PyTorch module exactly) for validation.
# ----------------------------------------------------------------------------
def dynamic_max_pool_reference(x, lengths, layer, total_layers, pool_ranges, top_k):
    xn = np.asarray(x, np.float32)
    B, S, D = xn.shape
    frac = (total_layers - layer) / total_layers
    pool_targets = [max(top_k, math.ceil(frac * int(l))) for l in np.asarray(lengths)]
    K_max = max(pool_targets)
    out = np.zeros((B, K_max, D), np.float32)
    pr = np.asarray(pool_ranges)
    for b in range(B):
        prange = int(pr[b])
        k = pool_targets[b]
        sample = xn[b, :prange]                                   # (prange, D)
        idx = np.argsort(-sample, axis=0, kind="stable")[:k]      # top-k indices per column
        idx = np.sort(idx, axis=0)                                # restore temporal order
        out[b, : idx.shape[0]] = np.take_along_axis(sample, idx, axis=0)
    return out, pool_targets


# ----------------------------------------------------------------------------
# Main
# ----------------------------------------------------------------------------
if __name__ == "__main__":
    B, S, D = 4, 16, 128            # batch, seq, feature (lane-dense last dim)
    top_k, layer, total_layers = 3, 1, 4

    key = jax.random.PRNGKey(0)
    x = jax.random.normal(key, (B, S, D), jnp.float32)
    lengths = np.array([16, 13, 9, 5], dtype=np.int32)      # original sequence lengths
    pool_ranges = np.array([16, 13, 9, 5], dtype=np.int32)  # currently valid prefix per sample

    out, out_ranges = dynamic_max_pool(x, lengths, layer, total_layers, pool_ranges, top_k)
    out = jax.block_until_ready(out)

    ref, ref_ranges = dynamic_max_pool_reference(
        np.asarray(x), lengths, layer, total_layers, pool_ranges, top_k)

    assert out_ranges == ref_ranges, (out_ranges, ref_ranges)
    assert out.shape == ref.shape, (out.shape, ref.shape)
    np.testing.assert_allclose(np.asarray(out), ref, rtol=1e-6, atol=1e-6)

    print("KERNEL_OK")
</pallas_src>

<mosaic_0001>
module attributes {stable_mosaic.version = 11 : i64} {
  func.func @_dkmax_kernel(%arg0: i32, %arg1: memref<4xi32, #tpu.memory_space<smem>>, %arg2: memref<4xi32, #tpu.memory_space<smem>>, %arg3: memref<2x16x128xf32, #tpu.memory_space<vmem>>, %arg4: memref<2x16x128xf32, #tpu.memory_space<vmem>>) attributes {dimension_semantics = [#tpu.dimension_semantics<parallel>], iteration_bounds = array<i64: 2>, scalar_prefetch = 2 : i64, scratch_operands = 0 : i64, tpu.core_type = #tpu.core_type<tc>, window_params = [{transform_indices = @transform_0, window_bounds = array<i64: 2, 16, 128>}, {transform_indices = @transform_1, window_bounds = array<i64: 2, 16, 128>}]} {
    %c2_i32 = arith.constant 2 : i32
    %0 = arith.muli %arg0, %c2_i32 : i32
    %c0 = arith.constant 0 : index
    %c0_0 = arith.constant 0 : index
    %c0_1 = arith.constant 0 : index
    %1 = vector.load %arg3[%c0, %c0_0, %c0_1] : memref<2x16x128xf32, #tpu.memory_space<vmem>>, vector<2x16x128xf32>
    %2 = tpu.iota {dimensions = array<i32: 0>} : vector<2x16x128xi32>
    %3 = tpu.iota {dimensions = array<i32: 1>} : vector<2x16x128xi32>
    %c0_i32 = arith.constant 0 : i32
    %4 = vector.broadcast %c0_i32 : i32 to vector<2x16x128xi32>
    %5 = arith.cmpi eq, %2, %4 : vector<2x16x128xi32>
    %c0_i32_2 = arith.constant 0 : i32
    %6 = arith.addi %0, %c0_i32_2 : i32
    %7 = arith.index_cast %6 : i32 to index
    %8 = memref.load %arg1[%7] : memref<4xi32, #tpu.memory_space<smem>>
    %9 = vector.broadcast %8 : i32 to vector<2x16x128xi32>
    %10 = arith.cmpi slt, %3, %9 : vector<2x16x128xi32>
    %11 = arith.andi %5, %10 : vector<2x16x128xi1>
    %c1_i32 = arith.constant 1 : i32
    %12 = vector.broadcast %c1_i32 : i32 to vector<2x16x128xi32>
    %13 = arith.cmpi eq, %2, %12 : vector<2x16x128xi32>
    %c1_i32_3 = arith.constant 1 : i32
    %14 = arith.addi %0, %c1_i32_3 : i32
    %15 = arith.index_cast %14 : i32 to index
    %16 = memref.load %arg1[%15] : memref<4xi32, #tpu.memory_space<smem>>
    %17 = vector.broadcast %16 : i32 to vector<2x16x128xi32>
    %18 = arith.cmpi slt, %3, %17 : vector<2x16x128xi32>
    %19 = arith.andi %13, %18 : vector<2x16x128xi1>
    %20 = arith.ori %11, %19 : vector<2x16x128xi1>
    %c0_i32_4 = arith.constant 0 : i32
    %21 = vector.broadcast %c0_i32_4 : i32 to vector<2x16x128xi32>
    %22 = vector.shape_cast %1 : vector<2x16x128xf32> to vector<2x1x16x128xf32>
    %23 = vector.shape_cast %3 : vector<2x16x128xi32> to vector<2x1x16x128xi32>
    %24 = vector.extract_strided_slice %1 {offsets = [0, 0, 0], sizes = [2, 8, 128], strides = [1, 1, 1]} : vector<2x16x128xf32> to vector<2x8x128xf32>
    %25 = vector.shape_cast %24 : vector<2x8x128xf32> to vector<2x8x1x128xf32>
    %26 = vector.extract_strided_slice %20 {offsets = [0, 0, 0], sizes = [2, 8, 128], strides = [1, 1, 1]} : vector<2x16x128xi1> to vector<2x8x128xi1>
    %27 = vector.shape_cast %26 : vector<2x8x128xi1> to vector<2x8x1x128xi1>
    %28 = vector.extract_strided_slice %3 {offsets = [0, 0, 0], sizes = [2, 8, 128], strides = [1, 1, 1]} : vector<2x16x128xi32> to vector<2x8x128xi32>
    %29 = vector.shape_cast %28 : vector<2x8x128xi32> to vector<2x8x1x128xi32>
    %30 = vector.broadcast %25 : vector<2x8x1x128xf32> to vector<2x8x16x128xf32>
    %31 = vector.broadcast %22 : vector<2x1x16x128xf32> to vector<2x8x16x128xf32>
    %32 = arith.cmpf ogt, %30, %31 : vector<2x8x16x128xf32>
    %33 = vector.broadcast %25 : vector<2x8x1x128xf32> to vector<2x8x16x128xf32>
    %34 = vector.broadcast %22 : vector<2x1x16x128xf32> to vector<2x8x16x128xf32>
    %35 = arith.cmpf oeq, %33, %34 : vector<2x8x16x128xf32>
    %36 = vector.broadcast %29 : vector<2x8x1x128xi32> to vector<2x8x16x128xi32>
    %37 = vector.broadcast %23 : vector<2x1x16x128xi32> to vector<2x8x16x128xi32>
    %38 = arith.cmpi slt, %36, %37 : vector<2x8x16x128xi32>
    %39 = arith.andi %35, %38 : vector<2x8x16x128xi1>
    %40 = arith.ori %32, %39 : vector<2x8x16x128xi1>
    %41 = vector.broadcast %27 : vector<2x8x1x128xi1> to vector<2x8x16x128xi1>
    %42 = arith.andi %41, %40 : vector<2x8x16x128xi1>
    %43 = arith.extui %42 : vector<2x8x16x128xi1> to vector<2x8x16x128xi32>
    %cst = arith.constant dense<0> : vector<2x16x128xi32>
    %44 = vector.multi_reduction <add>, %43, %cst [1] : vector<2x8x16x128xi32> to vector<2x16x128xi32>
    %45 = arith.addi %21, %44 : vector<2x16x128xi32>
    %46 = vector.extract_strided_slice %1 {offsets = [0, 8, 0], sizes = [2, 8, 128], strides = [1, 1, 1]} : vector<2x16x128xf32> to vector<2x8x128xf32>
    %47 = vector.shape_cast %46 : vector<2x8x128xf32> to vector<2x8x1x128xf32>
    %48 = vector.extract_strided_slice %20 {offsets = [0, 8, 0], sizes = [2, 8, 128], strides = [1, 1, 1]} : vector<2x16x128xi1> to vector<2x8x128xi1>
    %49 = vector.shape_cast %48 : vector<2x8x128xi1> to vector<2x8x1x128xi1>
    %50 = vector.extract_strided_slice %3 {offsets = [0, 8, 0], sizes = [2, 8, 128], strides = [1, 1, 1]} : vector<2x16x128xi32> to vector<2x8x128xi32>
    %51 = vector.shape_cast %50 : vector<2x8x128xi32> to vector<2x8x1x128xi32>
    %52 = vector.broadcast %47 : vector<2x8x1x128xf32> to vector<2x8x16x128xf32>
    %53 = vector.broadcast %22 : vector<2x1x16x128xf32> to vector<2x8x16x128xf32>
    %54 = arith.cmpf ogt, %52, %53 : vector<2x8x16x128xf32>
    %55 = vector.broadcast %47 : vector<2x8x1x128xf32> to vector<2x8x16x128xf32>
    %56 = vector.broadcast %22 : vector<2x1x16x128xf32> to vector<2x8x16x128xf32>
    %57 = arith.cmpf oeq, %55, %56 : vector<2x8x16x128xf32>
    %58 = vector.broadcast %51 : vector<2x8x1x128xi32> to vector<2x8x16x128xi32>
    %59 = vector.broadcast %23 : vector<2x1x16x128xi32> to vector<2x8x16x128xi32>
    %60 = arith.cmpi slt, %58, %59 : vector<2x8x16x128xi32>
    %61 = arith.andi %57, %60 : vector<2x8x16x128xi1>
    %62 = arith.ori %54, %61 : vector<2x8x16x128xi1>
    %63 = vector.broadcast %49 : vector<2x8x1x128xi1> to vector<2x8x16x128xi1>
    %64 = arith.andi %63, %62 : vector<2x8x16x128xi1>
    %65 = arith.extui %64 : vector<2x8x16x128xi1> to vector<2x8x16x128xi32>
    %cst_5 = arith.constant dense<0> : vector<2x16x128xi32>
    %66 = vector.multi_reduction <add>, %65, %cst_5 [1] : vector<2x8x16x128xi32> to vector<2x16x128xi32>
    %67 = arith.addi %45, %66 : vector<2x16x128xi32>
    %c0_i32_6 = arith.constant 0 : i32
    %68 = vector.broadcast %c0_i32_6 : i32 to vector<2x16x128xi32>
    %69 = arith.cmpi eq, %2, %68 : vector<2x16x128xi32>
    %c0_i32_7 = arith.constant 0 : i32
    %70 = arith.addi %0, %c0_i32_7 : i32
    %71 = arith.index_cast %70 : i32 to index
    %72 = memref.load %arg2[%71] : memref<4xi32, #tpu.memory_space<smem>>
    %73 = vector.broadcast %72 : i32 to vector<2x16x128xi32>
    %74 = arith.cmpi slt, %67, %73 : vector<2x16x128xi32>
    %75 = arith.andi %69, %74 : vector<2x16x128xi1>
    %c1_i32_8 = arith.constant 1 : i32
    %76 = vector.broadcast %c1_i32_8 : i32 to vector<2x16x128xi32>
    %77 = arith.cmpi eq, %2, %76 : vector<2x16x128xi32>
    %c1_i32_9 = arith.constant 1 : i32
    %78 = arith.addi %0, %c1_i32_9 : i32
    %79 = arith.index_cast %78 : i32 to index
    %80 = memref.load %arg2[%79] : memref<4xi32, #tpu.memory_space<smem>>
    %81 = vector.broadcast %80 : i32 to vector<2x16x128xi32>
    %82 = arith.cmpi slt, %67, %81 : vector<2x16x128xi32>
    %83 = arith.andi %77, %82 : vector<2x16x128xi1>
    %84 = arith.ori %75, %83 : vector<2x16x128xi1>
    %85 = arith.andi %20, %84 : vector<2x16x128xi1>
    %cst_10 = arith.constant 0.000000e+00 : f32
    %86 = vector.broadcast %cst_10 : f32 to vector<2x16x128xf32>
    %87 = arith.select %85, %1, %86 : vector<2x16x128xi1>, vector<2x16x128xf32>
    %c0_i32_11 = arith.constant 0 : i32
    %88 = vector.broadcast %c0_i32_11 : i32 to vector<2x1x128xi32>
    %cst_12 = arith.constant 0.000000e+00 : f32
    %89 = vector.broadcast %cst_12 : f32 to vector<2x16x128xf32>
    %90 = vector.extract_strided_slice %85 {offsets = [0, 0, 0], sizes = [2, 8, 128], strides = [1, 1, 1]} : vector<2x16x128xi1> to vector<2x8x128xi1>
    %91 = arith.extui %90 : vector<2x8x128xi1> to vector<2x8x128xi32>
    %92 = vector.extract_strided_slice %87 {offsets = [0, 0, 0], sizes = [2, 8, 128], strides = [1, 1, 1]} : vector<2x16x128xf32> to vector<2x8x128xf32>
    %93 = tpu.iota {dimensions = array<i32: 1>} : vector<2x8x8x128xi32>
    %94 = tpu.iota {dimensions = array<i32: 2>} : vector<2x8x8x128xi32>
    %95 = arith.cmpi slt, %93, %94 : vector<2x8x8x128xi32>
    %96 = vector.shape_cast %91 : vector<2x8x128xi32> to vector<2x8x1x128xi32>
    %c0_i32_13 = arith.constant 0 : i32
    %97 = vector.shape_cast %96 : vector<2x8x1x128xi32> to vector<2x8x1x128xi32>
    %98 = vector.broadcast %97 : vector<2x8x1x128xi32> to vector<2x8x8x128xi32>
    %99 = vector.broadcast %c0_i32_13 : i32 to vector<2x8x8x128xi32>
    %100 = arith.select %95, %98, %99 : vector<2x8x8x128xi1>, vector<2x8x8x128xi32>
    %cst_14 = arith.constant dense<0> : vector<2x8x128xi32>
    %101 = vector.multi_reduction <add>, %100, %cst_14 [1] : vector<2x8x8x128xi32> to vector<2x8x128xi32>
    %102 = vector.broadcast %88 : vector<2x1x128xi32> to vector<2x8x128xi32>
    %103 = arith.addi %101, %102 : vector<2x8x128xi32>
    %cst_15 = arith.constant dense<0> : vector<2x128xi32>
    %104 = vector.multi_reduction <add>, %91, %cst_15 [1] : vector<2x8x128xi32> to vector<2x128xi32>
    %105 = vector.shape_cast %104 : vector<2x128xi32> to vector<2x1x128xi32>
    %106 = arith.addi %88, %105 : vector<2x1x128xi32>
    %c16_i32 = arith.constant 16 : i32
    %107 = vector.broadcast %c16_i32 : i32 to vector<2x8x128xi32>
    %108 = arith.select %90, %103, %107 : vector<2x8x128xi1>, vector<2x8x128xi32>
    %109 = tpu.iota {dimensions = array<i32: 2>} : vector<2x8x16x128xi32>
    %110 = vector.shape_cast %108 : vector<2x8x128xi32> to vector<2x8x1x128xi32>
    %111 = vector.broadcast %110 : vector<2x8x1x128xi32> to vector<2x8x16x128xi32>
    %112 = arith.cmpi eq, %111, %109 : vector<2x8x16x128xi32>
    %113 = vector.shape_cast %92 : vector<2x8x128xf32> to vector<2x8x1x128xf32>
    %cst_16 = arith.constant 0.000000e+00 : f32
    %114 = vector.shape_cast %113 : vector<2x8x1x128xf32> to vector<2x8x1x128xf32>
    %115 = vector.broadcast %114 : vector<2x8x1x128xf32> to vector<2x8x16x128xf32>
    %116 = vector.broadcast %cst_16 : f32 to vector<2x8x16x128xf32>
    %117 = arith.select %112, %115, %116 : vector<2x8x16x128xi1>, vector<2x8x16x128xf32>
    %cst_17 = arith.constant dense<0.000000e+00> : vector<2x16x128xf32>
    %118 = vector.multi_reduction <add>, %117, %cst_17 [1] : vector<2x8x16x128xf32> to vector<2x16x128xf32>
    %119 = arith.addf %89, %118 : vector<2x16x128xf32>
    %120 = vector.extract_strided_slice %85 {offsets = [0, 8, 0], sizes = [2, 8, 128], strides = [1, 1, 1]} : vector<2x16x128xi1> to vector<2x8x128xi1>
    %121 = arith.extui %120 : vector<2x8x128xi1> to vector<2x8x128xi32>
    %122 = vector.extract_strided_slice %87 {offsets = [0, 8, 0], sizes = [2, 8, 128], strides = [1, 1, 1]} : vector<2x16x128xf32> to vector<2x8x128xf32>
    %123 = tpu.iota {dimensions = array<i32: 1>} : vector<2x8x8x128xi32>
    %124 = tpu.iota {dimensions = array<i32: 2>} : vector<2x8x8x128xi32>
    %125 = arith.cmpi slt, %123, %124 : vector<2x8x8x128xi32>
    %126 = vector.shape_cast %121 : vector<2x8x128xi32> to vector<2x8x1x128xi32>
    %c0_i32_18 = arith.constant 0 : i32
    %127 = vector.shape_cast %126 : vector<2x8x1x128xi32> to vector<2x8x1x128xi32>
    %128 = vector.broadcast %127 : vector<2x8x1x128xi32> to vector<2x8x8x128xi32>
    %129 = vector.broadcast %c0_i32_18 : i32 to vector<2x8x8x128xi32>
    %130 = arith.select %125, %128, %129 : vector<2x8x8x128xi1>, vector<2x8x8x128xi32>
    %cst_19 = arith.constant dense<0> : vector<2x8x128xi32>
    %131 = vector.multi_reduction <add>, %130, %cst_19 [1] : vector<2x8x8x128xi32> to vector<2x8x128xi32>
    %132 = vector.broadcast %106 : vector<2x1x128xi32> to vector<2x8x128xi32>
    %133 = arith.addi %131, %132 : vector<2x8x128xi32>
    %c16_i32_20 = arith.constant 16 : i32
    %134 = vector.broadcast %c16_i32_20 : i32 to vector<2x8x128xi32>
    %135 = arith.select %120, %133, %134 : vector<2x8x128xi1>, vector<2x8x128xi32>
    %136 = tpu.iota {dimensions = array<i32: 2>} : vector<2x8x16x128xi32>
    %137 = vector.shape_cast %135 : vector<2x8x128xi32> to vector<2x8x1x128xi32>
    %138 = vector.broadcast %137 : vector<2x8x1x128xi32> to vector<2x8x16x128xi32>
    %139 = arith.cmpi eq, %138, %136 : vector<2x8x16x128xi32>
    %140 = vector.shape_cast %122 : vector<2x8x128xf32> to vector<2x8x1x128xf32>
    %cst_21 = arith.constant 0.000000e+00 : f32
    %141 = vector.shape_cast %140 : vector<2x8x1x128xf32> to vector<2x8x1x128xf32>
    %142 = vector.broadcast %141 : vector<2x8x1x128xf32> to vector<2x8x16x128xf32>
    %143 = vector.broadcast %cst_21 : f32 to vector<2x8x16x128xf32>
    %144 = arith.select %139, %142, %143 : vector<2x8x16x128xi1>, vector<2x8x16x128xf32>
    %cst_22 = arith.constant dense<0.000000e+00> : vector<2x16x128xf32>
    %145 = vector.multi_reduction <add>, %144, %cst_22 [1] : vector<2x8x16x128xf32> to vector<2x16x128xf32>
    %146 = arith.addf %119, %145 : vector<2x16x128xf32>
    %c0_23 = arith.constant 0 : index
    %c0_24 = arith.constant 0 : index
    %c0_25 = arith.constant 0 : index
    %147 = vector.load %arg4[%c0_23, %c0_24, %c0_25] : memref<2x16x128xf32, #tpu.memory_space<vmem>>, vector<2x16x128xf32>
    tpu.vector_store %arg4[%c0_23, %c0_24, %c0_25], %146 {strides = array<i32>} : memref<2x16x128xf32, #tpu.memory_space<vmem>>, vector<2x16x128xf32>,
    return
  }
  func.func @transform_0(%arg0: i32, %arg1: memref<4xi32, #tpu.memory_space<smem>>, %arg2: memref<4xi32, #tpu.memory_space<smem>>) -> (i32, i32, i32) {
    %c0_i32 = arith.constant 0 : i32
    %c0_i32_0 = arith.constant 0 : i32
    %c0_i32_1 = arith.constant 0 : i32
    return %arg0, %c0_i32, %c0_i32_0 : i32, i32, i32
  }
  func.func @transform_1(%arg0: i32, %arg1: memref<4xi32, #tpu.memory_space<smem>>, %arg2: memref<4xi32, #tpu.memory_space<smem>>) -> (i32, i32, i32) {
    %c0_i32 = arith.constant 0 : i32
    %c0_i32_0 = arith.constant 0 : i32
    %c0_i32_1 = arith.constant 0 : i32
    return %arg0, %c0_i32, %c0_i32_0 : i32, i32, i32
  }
}

</mosaic_0001>

<bundles_post_ra>
// kernel: tpu_custom_call.1
= control target key start
LH: loop header
LB: loop body
LE: loop exit
PB: predicated region body
PF: predicated region fallthrough
CT: control target
= control target key end

     0   :  { %s1730_s18 = smov [#allocation3]   ;;  %s1731_s19 = smov [#allocation4]   ;;  %s5191_s0 = inlined_call_operand.hbm [shape: s32[4], index: 0, kind: input, shape index: {}]   ;;  %s5192_s2 = inlined_call_operand.hbm [shape: f32[4,16,128], index: 2, kind: input, shape index: {}]   ;;  %s5193_s3 = inlined_call_operand.hbm [shape: f32[4,16,128], index: 3, kind: output, shape index: {}]   ;;  %s5194_s1 = inlined_call_operand.hbm [shape: s32[4], index: 1, kind: input, shape index: {}]  }
   0x1   :  { %s9_s14 = sshll.u32 %s5191_s0, 4  ;;  %s14_s17 = sshll.u32 %s5194_s1, 4  ;;  %s10_s14 = int_to_ptr.hbm [resolvable:$true] %s9_s14  ;;  %s15_s17 = int_to_ptr.hbm [resolvable:$true] %s14_s17 }
   0x2   :  { %12 = dma.hbm_to_smem %s10_s14, 16, %s1730_s18, [#allocation2] }
   0x3   :  { %17 = dma.hbm_to_smem %s15_s17, 16, %s1731_s19, [#allocation2] }
   0x4   :  { %1704 = dma.done.wait [#allocation2], 32 }
   0x5   :  { %1705 = vsyncadd [#allocation2], 4294967264 }
   0x6   :  { %20 = sfence }
   0x7   :  { %21 = vsyncpa [#allocation6], 0 }
   0x8   :  { %23 = vsyncpa [#allocation6 + $0x1], 0 }
   0x9   :  { %24 = vsyncpa [#allocation7], 0 }
   0xa   :  { %26 = vsyncpa [#allocation7 + $0x1], 0  ;;  %s1763_s20 = smov 0   ;;  %s1765_s0 = smov 0  }
   0xb   :  { %s1767_s21 = smov 0   ;;  %s1769_s1 = smov 0  }
   0xc LB: > { %s1784_s22 = sadd.s32 4294967295, %s1728_s1   ;;  %s1528_s23 = sadd.s32 4294967294, %s1728_s1   ;;  %s1728_s1 = sphi %s1769_s1, %s6620_s1   ;;  %s1724_s21 = sphi %s1767_s21, %s6619_s21   ;;  %s1720_s0 = sphi %s1765_s0, %s6618_s0   ;;  %s1716_s20 = sphi %s1763_s20, %s6617_s20  }
   0xd   : > { %s1788_s24 = sadd.s32 1, %s1728_s1   ;;  %s39_s25 = sadd.s32 1, %s1724_s21 }
   0xe   : > { %s36_s26 = ssub.s32 %s1728_s1, %s1788_s24  ;;  %p46_p0 = scmp.ne.s32.totalorder %s1724_s21, %s1720_s0 }
   0xf   : > { %p37_p1 = scmp.eq.s32.totalorder %s36_s26, 0  ;;  %p47_p2 = scmp.eq.s32.totalorder %s1728_s1, 0 }
  0x10   : > { %p52_p3 = scmp.ne.s32.totalorder %s1720_s0, %s1716_s20  ;;  %p53_p4 = scmp.eq.s32.totalorder %s1784_s22, 0 }
  0x11   : > { %s1800_s27 = scalar_select %p37_p1, %s1724_s21, %s39_s25  }
  0x12   : > { %p1802_p5 = por %p47_p2, %p46_p0  ;;  %p1806_p6 = por %p53_p4, %p52_p3 }
  0x13   : > { %p76_p7 = scmp.eq.s32.totalorder %s1784_s22, 1  ;;  %p82_p8 = scmp.eq.s32.totalorder %s1528_s23, 1 }
  0x14   : > { %p1561_p10 = scmp.lt.s32.totalorder %s1728_s1, 2  ;;  %s102_s5 = sand.u32 1, %s1724_s21  }
  0x15   : > { %p1813_p11 = por %p76_p7, %p46_p0  ;;  %p1817_p12 = por %p82_p8, %p52_p3 }
  0x16   : > { %s1546_s6 = sshll.u32 %s1728_s1, 5  ;;  %s1531_s7 = sshll.u32 %s102_s5, 5 }
  0x17   : > { %s112_s10 = scalar_lea.hbm %s5192_s2, %s1546_s6  ;;  %s106_s12 = scalar_lea.vmem [#allocation5], %s1531_s7 }
  0x18   : > { %s113_s11 = sshll.u32 %s112_s10, 4  ;;  %s115_s13 = sshll.u32 %s106_s12, 4  ;;  %s114_s11 = int_to_ptr.hbm [resolvable:$true] %s113_s11  ;;  %s116_s13 = int_to_ptr.vmem [resolvable:$true] %s115_s13 }
  0x19   : > { %p1828_p13 = pnand %p1561_p10, %p1802_p5  ;;  %p1535_p0 = scmp.ge.s32.totalorder %s1728_s1, 1 }
  0x1a   : > { %p123_p1 = scmp.lt.s32.totalorder %s1728_s1, 3  ;;  %s103_s15 = scalar_lea.sflag [#allocation6], %s102_s5 }
  0x1b   : > { %s1630_s16 = sshra.s32 %s114_s11, 4  ;;  %p1634_p3 = pneg %p1828_p13  ;;  %s1631_s16 = int_to_ptr.hbm [resolvable:$true] %s1630_s16 }
  0x1c   : > { %s1632_s17 = scalar_lea.hbm %s1631_s16, 32  ;;  %s1637_s23 = scalar_lea.hbm %s5192_s2, 64 }
  0x1d   : > { %p1633_p2 = scmp.ne.s32.totalorder %s1631_s16, %s1632_s17  ;;  %p1638_p5 = scmp.lt.s32.totalorder %s1631_s16, %s5192_s2 }
  0x1e   : > { %p1639_p8 = scmp.lt.s32.totalorder %s1637_s23, %s1632_s17 }
  0x1f   : > { %p1635_p4 = pnand %p1634_p3, %p1633_p2 }
  0x20   : > { %p1640_p10 = por %p1639_p8, %p1638_p5 }
  0x21   : > { %p1636_p7 = pneg %p1635_p4 }
  0x23   : > { %p1641_p9 = pnand %p1640_p10, %p1636_p7 }
  0x25   : > { %1644 = shalt.err (!%p1641_p9)
}
  0x26   : > { %s1732_s28 = smov 128   ;;  %s1733_s5 = smov 8  }
  0x27   : > { %1556 = dma.hbm_to_vmem [thread:$0]  (!%p1828_p13), %s114_s11, 512, %s116_s13, %s103_s15, %s1732_s28, %s1732_s28, %s1733_s5  }
  0x28   : > { %p124_p2 = pnand %p1535_p0, %p123_p1 }
  0x2a   : > { %127 = sbr.rel (%p124_p2) target bundleno = 418 (0x1a2), region = 24 }
  0x2f   : > { %s1849_s6 = sand.u32 1, %s1720_s0  }
  0x30   : > { %s1536_s7 = sshll.u32 %s1849_s6, 5  ;;  %s130_s8 = scalar_lea.sflag [#allocation6], %s1849_s6 }
  0x31   : > { %s1855_s9 = scalar_lea.vmem [#allocation5], %s1536_s7 }
  0x32   : > { %1707 = dma.done.wait (%p1806_p6), %s130_s8, 512  }
  0x33   : > { %1709 = vsyncadd (%p1806_p6), %s130_s8, 4294966784  ;;  %s1862_s10 = sshll.u32 %s1784_s22, 1  ;;  %v160_v0 = vlaneseq  ;;  %v1876_v3 = vld [vmem:[%s1855_s9] sm:$0xff]  ;;  %v5471_v8 = vmov 0  ;;  %v1893_v12 = vld [vmem:[%s1855_s9 + $0x10] sm:$0xff]  ;;  %v5474_v17 = vmov 0 }
  0x34   : > { %s171_s11 = sadd.s32 1, %s1862_s10  ;;  %s1866_s12 = sld [smem:[#allocation3 + %s1862_s10]]  ;;  %v186_v13 = vrot.slane %v1876_v3, 1  ;;  %v187_v18 = vrot.slane %v1876_v3, 2  ;;  %v188_v19 = vrot.slane %v1876_v3, 3  ;;  %v189_v20 = vrot.slane %v1876_v3, 4 }
  0x35   : > { %s1870_s13 = sld [smem:[#allocation3 + %s171_s11]]  ;;  %v1872_v1 = vshrl.u32 %v160_v0, 7  ;;  %v190_v21 = vrot.slane %v1876_v3, 5  ;;  %v191_v22 = vrot.slane %v1876_v3, 6  ;;  %v192_v23 = vrot.slane %v1876_v3, 7  ;;  %s1548_s15 = sshll.u32 %s1784_s22, 5 }
  0x36   : > { %v5206_v24 = vmov 0   ;;  %v193_v26 = vrot.slane %v1893_v12, 1  ;;  %v194_v27 = vrot.slane %v1893_v12, 2  ;;  %v195_v28 = vrot.slane %v1893_v12, 3  ;;  %s4037_s29 = sld [smem:[#allocation4 + %s1862_s10]]  ;;  %s1451_s17 = scalar_lea.hbm %s5193_s3, %s1548_s15 }
  0x37   : > { %5469 = vst [vmem:[#allocation12_spill] sm:$0xff] %v1872_v1  ;;  %v1879_v4 = vadd.s32 8, %v1872_v1  ;;  %v234_v6 = vperm.slane %v1872_v1, 0  ;;  %v235_v7 = vperm.slane %v1872_v1, 1  ;;  %v236_v9 = vperm.slane %v1872_v1, 2  ;;  %s4192_s14 = sld [smem:[#allocation4 + %s171_s11]] }
  0x38   : > { %v237_v10 = vperm.slane %v1872_v1, 3  ;;  %v238_v11 = vperm.slane %v1872_v1, 4  ;;  %v5205_v14 = vperm.slane %v1872_v1, 5  ;;  %v5204_v15 = vperm.slane %v1872_v1, 6  ;;  %s152_s18 = scalar_lea.vmem [#allocation8], %s1536_s7  ;;  %s1454_s23 = sshll.u32 %s1451_s17, 4  ;;  %s1455_s23 = int_to_ptr.hbm [resolvable:$true] %s1454_s23 }
  0x39   : > { %5470 = vst [vmem:[#allocation13_spill] sm:$0xff] %v1879_v4  ;;  %v5200_v16 = vperm.slane %v1872_v1, 7  ;;  %v196_v29 = vrot.slane %v1893_v12, 4  ;;  %vm1920_vm2 = vcmp.lt.s32.totalorder %v234_v6, %v1872_v1  ;;  %v197_v31 = vrot.slane %v1893_v12, 5  ;;  %s1452_s19 = sshll.u32 %s152_s18, 4  ;;  %s1439_s25 = scalar_lea.sflag [#allocation7], %s1849_s6  ;;  %s1453_s19 = int_to_ptr.vmem [resolvable:$true] %s1452_s19 }
  0x3a   : > { %v164_v2 = vstv %s1866_s12  ;;  %v198_v32 = vrot.slane %v1893_v12, 6  ;;  %v199_v33 = vrot.slane %v1893_v12, 7  ;;  %vm1933_vm3 = vcmp.lt.s32.totalorder %v235_v7, %v1872_v1  ;;  %s1674_s26 = sshra.s32 %s1455_s23, 4  ;;  %s1680_s8 = scalar_lea.hbm %s5193_s3, 64  ;;  %s1675_s26 = int_to_ptr.hbm [resolvable:$true] %s1674_s26 }
  0x3b   : > { %v173_v5 = vstv %s1870_s13  ;;  %vm1885_vm0 = vcmp.lt.s32.totalorder %v1872_v1, %v164_v2  ;;  %v1949_v47 = vperm.slane %v1876_v3, 0  ;;  %v1954_v51 = vperm.slane %v186_v13, 0  ;;  %s1676_s28 = scalar_lea.hbm %s1675_s26, 32  ;;  %p1681_p0 = scmp.lt.s32.totalorder %s1675_s26, %s5193_s3 }
  0x3c   : > { %v5472_v8 = vsel %vm1885_vm0, 4294967295, %v5471_v8  ;;  %vm1900_vm1 = vcmp.lt.s32.totalorder %v1872_v1, %v173_v5  ;;  %v1913_v25 = vsel %vm1885_vm0, 1, %v5206_v24  ;;  %vm1957_vm4 = vcmp.lt.s32.totalorder %v234_v6, %v1879_v4  ;;  %p1677_p6 = scmp.ne.s32.totalorder %s1675_s26, %s1676_s28  ;;  %p1682_p1 = scmp.lt.s32.totalorder %s1680_s8, %s1676_s28 }
  0x3d   : > { %5473 = vst [vmem:[#allocation14_spill] sm:$0xff] %v5472_v8  ;;  %v5475_v17 = vsel %vm1900_vm1, 4294967295, %v5474_v17  ;;  %v1930_v34 = vsel %vm1900_vm1, 1, %v5206_v24  ;;  %v202_v36 = vperm.slane %v1913_v25, 0  ;;  %v203_v37 = vperm.slane %v1913_v25, 1 }
  0x3e   : > { %5476 = vst [vmem:[#allocation15_spill] sm:$0xff] %v5475_v17  ;;  %v204_v38 = vperm.slane %v1913_v25, 2  ;;  %vm1962_vm5 = vcmp.lt.s32.totalorder %v235_v7, %v1879_v4  ;;  %vm1967_vm6 = vcmp.lt.s32.totalorder %v1879_v4, %v164_v2  ;;  %v5485_v54 = vmov 0  ;;  %p1678_p9 = pnand %p1677_p6, %p1813_p11  ;;  %p1683_p3 = por %p1682_p1, %p1681_p0 }
  0x3f   : > { %v5486_v54 = vsel %vm1967_vm6, 4294967295, %v5485_v54  ;;  %v1973_v57 = vperm.slane %v187_v18, 0  ;;  %v1976_v58 = vperm.slane %v1893_v12, 0  ;;  %vm1979_vm7 = vcmp.lt.s32.totalorder %v1879_v4, %v173_v5  ;;  %v2008_v18 = vld [vmem:[%s1855_s9 + $0x8] sm:$0xff] }
  0x40   : > { %5487 = vst [vmem:[#allocation16_spill] sm:$0xff] %v5486_v54  ;;  %v5488_v59 = vmov 0  ;;  %v1983_v60 = vperm.slane %v188_v19, 0  ;;  %v1985_v61 = vperm.slane %v189_v20, 0  ;;  %v1987_v62 = vperm.slane %v190_v21, 0  ;;  %p1679_p13 = pneg %p1678_p9 }
  0x41   : > { %v5489_v59 = vsel %vm1979_vm7, 4294967295, %v5488_v59  ;;  %v1989_v63 = vperm.slane %v193_v26, 0  ;;  %v1991_v0 = vperm.slane %v191_v22, 0  ;;  %v1993_v2 = vperm.slane %v192_v23, 0  ;;  %v2057_v26 = vld [vmem:[%s1855_s9 + $0x18] sm:$0xff] }
  0x42   : > { %5490 = vst [vmem:[#allocation17_spill] sm:$0xff] %v5489_v59  ;;  %v1995_v6 = vperm.slane %v194_v27, 0  ;;  %vm306_vm8 = vcmp.eq.f32.partialorder %v1949_v47, %v1876_v3  ;;  %v1999_v5 = vperm.slane %v195_v28, 0  ;;  %v2001_v7 = vperm.slane %v196_v29, 0  ;;  %p1684_p4 = pnand %p1683_p3, %p1679_p13 }
  0x43   : > { %5491 = vst [vmem:[#allocation18_spill] sm:$0xff] %v1985_v61  ;;  %v2003_v13 = vperm.slane %v197_v31, 0  ;;  %v2010_v19 = vperm.slane %v198_v32, 0  ;;  %v2012_v20 = vperm.slane %v199_v33, 0  ;;  %vm2028_vm9 = vmand %vm306_vm8, %vm1920_vm2  ;;  %vm2043_vm15 = vcmp.lt.s32.totalorder %v236_v9, %v1872_v1 }
  0x44   : > { %5492 = vst [vmem:[#allocation19_spill] sm:$0xff] %v1987_v62  ;;  %vm5501_vm8 = vcmp.eq.f32.partialorder %v1954_v51, %v1876_v3  ;;  %v5502_v23 = vmov 0  ;;  %vm5506_vm14 = vcmp.eq.f32.partialorder %v1976_v58, %v1893_v12  ;;  %v5507_v28 = vmov 0 }
  0x45   : > { %5493 = vst [vmem:[#allocation20_spill] sm:$0xff] %v1991_v0  ;;  %vm2052_vm10 = vmand %vm5501_vm8, %vm1933_vm3  ;;  %vm2070_vm8 = vcmp.lt.s32.totalorder %v237_v10, %v1872_v1  ;;  %v5512_v30 = vmov 0  ;;  %vm2111_vm11 = vcmp.ne.s32.totalorder %v202_v36, 0  ;;  %v5514_v31 = vmov 0 }
  0x46   : > { %5494 = vst [vmem:[#allocation21_spill] sm:$0xff] %v1993_v2  ;;  %v5503_v23 = vsel %vm2052_vm10, 4294967295, %v5502_v23  ;;  %vm2079_vm1 = vmand %vm5506_vm14, %vm1920_vm2  ;;  %vm2096_vm2 = vcmp.lt.s32.totalorder %v238_v11, %v1872_v1  ;;  %vm5511_vm14 = vcmp.eq.f32.partialorder %v1989_v63, %v1893_v12  ;;  %v5515_v31 = vsel %vm2111_vm11, 4294967295, %v5514_v31 }
  0x47   : > { %5495 = vst [vmem:[#allocation22_spill] sm:$0xff] %v2010_v19  ;;  %v5508_v28 = vsel %vm2079_vm1, 4294967295, %v5507_v28  ;;  %vm2105_vm13 = vmand %vm5511_vm14, %vm1933_vm3  ;;  %vm2126_vm14 = vcmp.lt.s32.totalorder %v5205_v14, %v1872_v1  ;;  %vm5519_vm12 = vcmp.eq.f32.partialorder %v1973_v57, %v1876_v3  ;;  %v5520_v33 = vmov 0 }
  0x48   : > { %5496 = vst [vmem:[#allocation23_spill] sm:$0xff] %v2012_v20  ;;  %v5513_v30 = vsel %vm2105_vm13, 4294967295, %v5512_v30  ;;  %vm2135_vm11 = vmand %vm5519_vm12, %vm2043_vm15  ;;  %v544_v35 = vrot.slane %v2008_v18, 1  ;;  %vm2142_vm10 = vcmp.ne.s32.totalorder %v203_v37, 0  ;;  %v5522_v36 = vmov 0 }
  0x49   : > { %5516 = vst [vmem:[#allocation24_spill] sm:$0xff] %v5515_v31  ;;  %v5521_v33 = vsel %vm2135_vm11, 4294967295, %v5520_v33  ;;  %v5523_v36 = vsel %vm2142_vm10, 4294967295, %v5522_v36  ;;  %vm2161_vm10 = vcmp.lt.s32.totalorder %v236_v9, %v1879_v4  ;;  %vm5527_vm0 = vcmp.eq.f32.partialorder %v1949_v47, %v2008_v18 }
  0x4a   : > { %5524 = vst [vmem:[#allocation25_spill] sm:$0xff] %v5523_v36  ;;  %vm2170_vm3 = vmand %vm5527_vm0, %vm1957_vm4  ;;  %v5528_v56 = vmov 0  ;;  %vm5530_vm11 = vcmp.eq.f32.partialorder %v1954_v51, %v2008_v18  ;;  %v5531_v55 = vmov 0  ;;  %vm5533_vm1 = vcmp.eq.f32.partialorder %v1983_v60, %v1876_v3 }
  0x4b   : > { %v5529_v56 = vsel %vm2170_vm3, 4294967295, %v5528_v56  ;;  %vm2179_vm12 = vmand %vm5530_vm11, %vm1962_vm5  ;;  %v5534_v9 = vmov 0  ;;  %vm2195_vm0 = vcmp.lt.s32.totalorder %v237_v10, %v1879_v4  ;;  %v5536_v50 = vmov 0 }
  0x4c   : > { %v5532_v55 = vsel %vm2179_vm12, 4294967295, %v5531_v55  ;;  %vm2188_vm13 = vmand %vm5533_vm1, %vm2070_vm8  ;;  %v5537_v50 = vsel %vm2195_vm0, 4294967295, %v5536_v50  ;;  %vm2202_vm11 = vcmp.lt.s32.totalorder %v5204_v15, %v1872_v1  ;;  %vm2209_vm1 = vcmp.lt.s32.totalorder %v5200_v16, %v1872_v1 }
  0x4d   : > { %v5535_v9 = vsel %vm2188_vm13, 4294967295, %v5534_v9  ;;  %v5540_v49 = vmov 0  ;;  %vm5542_vm12 = vcmp.eq.f32.partialorder %v1985_v61, %v1876_v3  ;;  %v5543_v10 = vmov 0 }
  0x4e   : > { %v5541_v49 = vsel %vm2209_vm1, 4294967295, %v5540_v49  ;;  %vm2218_vm3 = vmand %vm5542_vm12, %vm2096_vm2  ;;  %v2225_v42 = vsel %vm1967_vm6, 1, %v5206_v24  ;;  %vm2229_vm0 = vcmp.ne.s32.totalorder %v204_v38, 0  ;;  %v5545_v16 = vmov 0 }
  0x4f   : > { %v5544_v10 = vsel %vm2218_vm3, 4294967295, %v5543_v10  ;;  %v5546_v16 = vsel %vm2229_vm0, 4294967295, %v5545_v16  ;;  %vm2242_vm6 = vcmp.lt.s32.totalorder %v238_v11, %v1879_v4  ;;  %vm5550_vm0 = vcmp.eq.f32.partialorder %v1987_v62, %v1876_v3 }
  0x50   : > { %5547 = vst [vmem:[#allocation26_spill] sm:$0xff] %v5546_v16  ;;  %vm2251_vm13 = vmand %vm5550_vm0, %vm2126_vm14  ;;  %v5551_v38 = vmov 0  ;;  %vm5553_vm1 = vcmp.eq.f32.partialorder %v1995_v6, %v1893_v12  ;;  %v545_v11 = vrot.slane %v2008_v18, 2  ;;  %v2270_v40 = vsel %vm1979_vm7, 1, %v5206_v24 }
  0x51   : > { %v5552_v38 = vsel %vm2251_vm13, 4294967295, %v5551_v38  ;;  %vm2260_vm3 = vmand %vm5553_vm1, %vm2043_vm15  ;;  %vm5556_vm15 = vcmp.eq.f32.partialorder %v1999_v5, %v1893_v12  ;;  %v5557_v22 = vmov 0  ;;  %v2286_v14 = vperm.slane %v2008_v18, 0 }
  0x52   : > { %vm2279_vm1 = vmand %vm5556_vm15, %vm2070_vm8  ;;  %v2288_v24 = vperm.slane %v544_v35, 0  ;;  %vm5559_vm8 = vcmp.gt.f32.partialorder %v1949_v47, %v1876_v3  ;;  %v5560_v27 = vmov 0  ;;  %v546_v15 = vrot.slane %v2008_v18, 3 }
  0x53   : > { %v5558_v22 = vsel %vm2279_vm1, 4294967295, %v5557_v22  ;;  %vm2297_vm15 = vmor %vm5559_vm8, %vm2028_vm9  ;;  %vm5562_vm8 = vcmp.eq.f32.partialorder %v1973_v57, %v2008_v18  ;;  %v5563_v21 = vmov 0  ;;  %vm5565_vm0 = vcmp.eq.f32.partialorder %v1976_v58, %v2057_v26 }
  0x54   : > { %v5561_v27 = vsel %vm2297_vm15, 4294967295, %v5560_v27  ;;  %vm2316_vm7 = vmand %vm5562_vm8, %vm2161_vm10  ;;  %v5566_v46 = vmov 0  ;;  %vm5568_vm9 = vcmp.eq.f32.partialorder %v1989_v63, %v2057_v26  ;;  %v5569_v35 = vmov 0 }
  0x55   : > { %v5564_v21 = vsel %vm2316_vm7, 4294967295, %v5563_v21  ;;  %vm2325_vm1 = vmand %vm5565_vm0, %vm1957_vm4  ;;  %vm5571_vm8 = vnez %v5503_v23  ;;  %vm5572_vm7 = vcmp.gt.f32.partialorder %v1954_v51, %v1876_v3  ;;  %v5573_v52 = vmov 0 }
  0x56   : > { %v5567_v46 = vsel %vm2325_vm1, 4294967295, %v5566_v46  ;;  %vm2334_vm12 = vmand %vm5568_vm9, %vm1962_vm5  ;;  %v547_v45 = vrot.slane %v2008_v18, 4  ;;  %v5575_v59 = vperm.slane %v1913_v25, 3  ;;  %v5576_v54 = vmov 0 }
  0x57   : > { %v5570_v35 = vsel %vm2334_vm12, 4294967295, %v5569_v35  ;;  %vm2343_vm13 = vmor %vm5572_vm7, %vm5571_vm8  ;;  %v5579_v23 = vperm.slane %v1930_v34, 0  ;;  %v5580_v17 = vmov 0  ;;  %v5583_v8 = vperm.slane %v1930_v34, 1 }
  0x58   : > { %v5574_v52 = vsel %vm2343_vm13, 4294967295, %v5573_v52  ;;  %vm2353_vm4 = vcmp.ne.s32.totalorder %v5575_v59, 0  ;;  %v5584_v53 = vmov 0  ;;  %v5587_v59 = vperm.slane %v1872_v1, 5 }
  0x59   : > { %v5577_v54 = vsel %vm2353_vm4, 4294967295, %v5576_v54  ;;  %vm2359_vm5 = vcmp.ne.s32.totalorder %v5579_v23, 0  ;;  %vm2365_vm7 = vcmp.ne.s32.totalorder %v5583_v8, 0  ;;  %v5588_v23 = vmov 0 }
  0x5a   : > { %5578 = vst [vmem:[#allocation27_spill] sm:$0xff] %v5577_v54  ;;  %v5581_v17 = vsel %vm2359_vm5, 4294967295, %v5580_v17  ;;  %v5585_v53 = vsel %vm2365_vm7, 4294967295, %v5584_v53  ;;  %vm2376_vm8 = vcmp.lt.s32.totalorder %v5587_v59, %v1879_v4  ;;  %vm5590_vm5 = vnez %v5521_v33 }
  0x5b   : > { %5582 = vst [vmem:[#allocation28_spill] sm:$0xff] %v5581_v17  ;;  %v5589_v23 = vsel %vm2376_vm8, 4294967295, %v5588_v23  ;;  %vm5591_vm4 = vcmp.gt.f32.partialorder %v1973_v57, %v1876_v3  ;;  %v5592_v8 = vmov 0  ;;  %v548_v44 = vrot.slane %v2008_v18, 5 }
  0x5c   : > { %5586 = vst [vmem:[#allocation29_spill] sm:$0xff] %v5585_v53  ;;  %vm2385_vm12 = vmor %vm5591_vm4, %vm5590_vm5  ;;  %v2392_v17 = vperm.slane %v545_v11, 0  ;;  %vm5595_vm4 = vcmp.eq.f32.partialorder %v1991_v0, %v1876_v3  ;;  %v5596_v33 = vmov 0  ;;  %vm5599_vm7 = vcmp.eq.f32.partialorder %v2001_v7, %v1893_v12 }
  0x5d   : > { %v5593_v8 = vsel %vm2385_vm12, 4294967295, %v5592_v8  ;;  %vm2403_vm5 = vmand %vm5595_vm4, %vm2202_vm11  ;;  %v5600_v11 = vmov 0  ;;  %vm5603_vm0 = vnez %v5535_v9  ;;  %vm5604_vm9 = vcmp.gt.f32.partialorder %v1983_v60, %v1876_v3 }
  0x5e   : > { %5594 = vst [vmem:[#allocation30_spill] sm:$0xff] %v5593_v8  ;;  %v5597_v33 = vsel %vm2403_vm5, 4294967295, %v5596_v33  ;;  %vm2412_vm8 = vmand %vm5599_vm7, %vm2096_vm2  ;;  %v5605_v59 = vmov 0  ;;  %v549_v39 = vrot.slane %v2008_v18, 6  ;;  %vm5608_vm2 = vnez %v5508_v28 }
  0x5f   : > { %5598 = vst [vmem:[#allocation31_spill] sm:$0xff] %v5597_v33  ;;  %v5601_v11 = vsel %vm2412_vm8, 4294967295, %v5600_v11  ;;  %vm2421_vm1 = vmor %vm5604_vm9, %vm5603_vm0  ;;  %vm5609_vm7 = vcmp.gt.f32.partialorder %v1976_v58, %v1893_v12  ;;  %v5610_v9 = vmov 0  ;;  %v2441_v29 = vperm.slane %v546_v15, 0 }
  0x60   : > { %5602 = vst [vmem:[#allocation32_spill] sm:$0xff] %v5601_v11  ;;  %v5606_v59 = vsel %vm2421_vm1, 4294967295, %v5605_v59  ;;  %vm2434_vm4 = vmor %vm5609_vm7, %vm5608_vm2  ;;  %v550_v11 = vrot.slane %v2008_v18, 7  ;;  %vm5613_vm7 = vnez %v5537_v50  ;;  %vm5614_vm8 = vcmp.eq.f32.partialorder %v1983_v60, %v2008_v18 }
  0x61   : > { %5607 = vst [vmem:[#allocation33_spill] sm:$0xff] %v5606_v59  ;;  %v5611_v9 = vsel %vm2434_vm4, 4294967295, %v5610_v9  ;;  %vm2454_vm5 = vmand %vm5614_vm8, %vm5613_vm7  ;;  %v5615_v28 = vmov 0  ;;  %vm5617_vm0 = vcmp.eq.f32.partialorder %v1995_v6, %v2057_v26  ;;  %v5618_v15 = vmov 0 }
  0x62   : > { %5612 = vst [vmem:[#allocation34_spill] sm:$0xff] %v5611_v9  ;;  %v5616_v28 = vsel %vm2454_vm5, 4294967295, %v5615_v28  ;;  %vm2463_vm4 = vmand %vm5617_vm0, %vm2161_vm10  ;;  %vm5621_vm9 = vnez %v5513_v30  ;;  %vm5622_vm2 = vcmp.gt.f32.partialorder %v1989_v63, %v1893_v12  ;;  %v5623_v54 = vmov 0 }
  0x63   : > { %v5619_v15 = vsel %vm2463_vm4, 4294967295, %v5618_v15  ;;  %vm2472_vm1 = vmor %vm5622_vm2, %vm5621_vm9  ;;  %v2477_v53 = vperm.slane %v547_v45, 0  ;;  %v5626_v37 = vperm.slane %v1879_v4, 0  ;;  %v5627_v59 = vmov 0  ;;  %v5787_v48 = vld [vmem:[#allocation29_spill] sm:$0xff] }
  0x64   : > { %5620 = vst [vmem:[#allocation35_spill] sm:$0xff] %v5619_v15  ;;  %v5624_v54 = vsel %vm2472_vm1, 4294967295, %v5623_v54  ;;  %v5629_v30 = vperm.slane %v1913_v25, 4  ;;  %v5630_v15 = vmov 0  ;;  %v5633_v33 = vperm.slane %v1930_v34, 2 }
  0x65   : > { %5625 = vst [vmem:[#allocation36_spill] sm:$0xff] %v5624_v54  ;;  %vm2484_vm10 = vcmp.lt.s32.totalorder %v5626_v37, %v1872_v1  ;;  %v5634_v45 = vmov 0  ;;  %v5637_v37 = vperm.slane %v1872_v1, 6  ;;  %vm5641_vm5 = vcmp.gt.f32.partialorder %v1985_v61, %v1876_v3 }
  0x66   : > { %v5628_v59 = vsel %vm2484_vm10, 4294967295, %v5627_v59  ;;  %vm2490_vm0 = vcmp.ne.s32.totalorder %v5629_v30, 0  ;;  %vm2496_vm9 = vcmp.ne.s32.totalorder %v5633_v33, 0  ;;  %v5638_v30 = vmov 0 }
  0x67   : > { %v5631_v15 = vsel %vm2490_vm0, 4294967295, %v5630_v15  ;;  %v5635_v45 = vsel %vm2496_vm9, 4294967295, %v5634_v45  ;;  %vm2507_vm4 = vcmp.lt.s32.totalorder %v5637_v37, %v1879_v4  ;;  %vm5640_vm0 = vnez %v5544_v10 }
  0x68   : > { %5632 = vst [vmem:[#allocation37_spill] sm:$0xff] %v5631_v15  ;;  %v5639_v30 = vsel %vm2507_vm4, 4294967295, %v5638_v30  ;;  %vm2516_vm1 = vmor %vm5641_vm5, %vm5640_vm0  ;;  %v5642_v33 = vmov 0  ;;  %vm5644_vm8 = vcmp.gt.f32.partialorder %v1995_v6, %v1893_v12  ;;  %v2534_v37 = vperm.slane %v548_v44, 0 }
  0x69   : > { %5636 = vst [vmem:[#allocation38_spill] sm:$0xff] %v5635_v45  ;;  %v5643_v33 = vsel %vm2516_vm1, 4294967295, %v5642_v33  ;;  %vm2525_vm2 = vmor %vm5644_vm8, %vm2260_vm3  ;;  %v5645_v45 = vmov 0  ;;  %v5649_v41 = vperm.slane %v1879_v4, 1  ;;  %v5650_v15 = vmov 0 }
  0x6a   : > { %v5646_v45 = vsel %vm2525_vm2, 4294967295, %v5645_v45  ;;  %vm5652_vm4 = vnez %v5541_v49  ;;  %vm5653_vm2 = vcmp.eq.f32.partialorder %v1993_v2, %v1876_v3  ;;  %v5654_v44 = vmov 0 }
  0x6b   : > { %5647 = vst [vmem:[#allocation39_spill] sm:$0xff] %v5646_v45  ;;  %vm2541_vm0 = vcmp.lt.s32.totalorder %v5649_v41, %v1872_v1  ;;  %vm2554_vm1 = vmand %vm5653_vm2, %vm5652_vm4  ;;  %vm5656_vm5 = vcmp.eq.f32.partialorder %v2003_v13, %v1893_v12  ;;  %v5657_v41 = vmov 0  ;;  %vm5659_vm8 = vnez %v5529_v56 }
  0x6c   : > { %v5651_v15 = vsel %vm2541_vm0, 4294967295, %v5650_v15  ;;  %v5655_v44 = vsel %vm2554_vm1, 4294967295, %v5654_v44  ;;  %vm2563_vm15 = vmand %vm5656_vm5, %vm2126_vm14  ;;  %vm5660_vm3 = vcmp.gt.f32.partialorder %v1949_v47, %v2008_v18  ;;  %v5661_v10 = vmov 0 }
  0x6d   : > { %v5658_v41 = vsel %vm2563_vm15, 4294967295, %v5657_v41  ;;  %vm2572_vm9 = vmor %vm5660_vm3, %vm5659_vm8  ;;  %vm5664_vm2 = vnez %v5532_v55  ;;  %vm5665_vm1 = vcmp.gt.f32.partialorder %v1954_v51, %v2008_v18  ;;  %v5666_v32 = vmov 0 }
  0x6e   : > { %v5662_v10 = vsel %vm2572_vm9, 4294967295, %v5661_v10  ;;  %vm2581_vm4 = vmor %vm5665_vm1, %vm5664_vm2  ;;  %v2590_v56 = vperm.slane %v549_v39, 0  ;;  %v5671_v55 = vperm.slane %v1879_v4, 2  ;;  %v5672_v51 = vmov 0 }
  0x6f   : > { %5663 = vst [vmem:[#allocation40_spill] sm:$0xff] %v5662_v10  ;;  %v5667_v32 = vsel %vm2581_vm4, 4294967295, %v5666_v32  ;;  %v2602_v10 = vperm.slane %v550_v11, 0  ;;  %v5676_v39 = vperm.slane %v1879_v4, 3  ;;  %v5677_v47 = vmov 0 }
  0x70   : > { %5668 = vst [vmem:[#allocation41_spill] sm:$0xff] %v5667_v32  ;;  %vm2597_vm8 = vcmp.lt.s32.totalorder %v5671_v55, %v1872_v1  ;;  %vm5679_vm5 = vcmp.eq.f32.partialorder %v2286_v14, %v1876_v3  ;;  %v5680_v55 = vmov 0  ;;  %v5682_v11 = vperm.slane %v1913_v25, 5 }
  0x71   : > { %5670 = vst [vmem:[#allocation42_spill] sm:$0xff] %v2590_v56  ;;  %v5673_v51 = vsel %vm2597_vm8, 4294967295, %v5672_v51  ;;  %vm2609_vm2 = vcmp.lt.s32.totalorder %v5676_v39, %v1872_v1  ;;  %vm2618_vm3 = vmand %vm5679_vm5, %vm2484_vm10  ;;  %v5683_v32 = vmov 0  ;;  %vm5686_vm5 = vcmp.eq.f32.partialorder %v1985_v61, %v2008_v18 }
  0x72   : > { %5674 = vst [vmem:[#allocation43_spill] sm:$0xff] %v5673_v51  ;;  %v5678_v47 = vsel %vm2609_vm2, 4294967295, %v5677_v47  ;;  %v5681_v55 = vsel %vm2618_vm3, 4294967295, %v5680_v55  ;;  %vm2624_vm4 = vcmp.ne.s32.totalorder %v5682_v11, 0  ;;  %vm2637_vm15 = vmand %vm5686_vm5, %vm2242_vm6  ;;  %v5687_v39 = vmov 0 }
  0x73   : > { %5675 = vst [vmem:[#allocation44_spill] sm:$0xff] %v2602_v10  ;;  %v5684_v32 = vsel %vm2624_vm4, 4294967295, %v5683_v32  ;;  %v5688_v39 = vsel %vm2637_vm15, 4294967295, %v5687_v39  ;;  %vm5690_vm4 = vcmp.eq.f32.partialorder %v1999_v5, %v2057_v26  ;;  %v5691_v11 = vmov 0 }
  0x74   : > { %5685 = vst [vmem:[#allocation45_spill] sm:$0xff] %v5684_v32  ;;  %vm2646_vm3 = vmand %vm5690_vm4, %vm5613_vm7  ;;  %vm5694_vm9 = vnez %v5552_v38  ;;  %vm5695_vm1 = vcmp.gt.f32.partialorder %v1987_v62, %v1876_v3  ;;  %v5696_v32 = vmov 0  ;;  %v2664_v50 = vperm.slane %v2057_v26, 0 }
  0x75   : > { %5689 = vst [vmem:[#allocation46_spill] sm:$0xff] %v5688_v39  ;;  %v5692_v11 = vsel %vm2646_vm3, 4294967295, %v5691_v11  ;;  %vm2655_vm10 = vmor %vm5695_vm1, %vm5694_vm9  ;;  %v5700_v61 = vrot.slane %v2057_v26, 1  ;;  %v5701_v38 = vperm.slane %v1879_v4, 4  ;;  %vm5705_vm9 = vcmp.eq.f32.partialorder %v2288_v24, %v1876_v3 }
  0x76   : > { %5693 = vst [vmem:[#allocation47_spill] sm:$0xff] %v5692_v11  ;;  %v5697_v32 = vsel %vm2655_vm10, 4294967295, %v5696_v32  ;;  %vm2684_vm1 = vmand %vm5705_vm9, %vm2541_vm0  ;;  %v5706_v8 = vmov 0  ;;  %v5709_v16 = vmov 0  ;;  %v5713_v39 = vmov 0 }
  0x77   : > { %5698 = vst [vmem:[#allocation48_spill] sm:$0xff] %v5697_v32  ;;  %v2668_v11 = vperm.slane %v5700_v61, 0  ;;  %vm2675_vm7 = vcmp.lt.s32.totalorder %v5701_v38, %v1872_v1  ;;  %v5702_v32 = vmov 0  ;;  %v5707_v8 = vsel %vm2684_vm1, 4294967295, %v5706_v8 }
  0x78   : > { %v5703_v32 = vsel %vm2675_vm7, 4294967295, %v5702_v32  ;;  %v5708_v61 = vperm.slane %v1930_v34, 3  ;;  %v5712_v38 = vperm.slane %v1872_v1, 7  ;;  %vm5716_vm9 = vnez %v5558_v22 }
  0x79   : > { %5704 = vst [vmem:[#allocation49_spill] sm:$0xff] %v5703_v32  ;;  %vm5717_vm10 = vcmp.gt.f32.partialorder %v1999_v5, %v1893_v12  ;;  %v5724_v22 = vperm.slane %v1879_v4, 5  ;;  %v5736_v51 = vmov 0  ;;  %v5739_v43 = vperm.slane %v1879_v4, 1 }
  0x7a   : > { %vm2690_vm15 = vcmp.ne.s32.totalorder %v5708_v61, 0  ;;  %vm2701_vm5 = vcmp.lt.s32.totalorder %v5712_v38, %v1879_v4  ;;  %vm2710_vm3 = vmor %vm5717_vm10, %vm5716_vm9  ;;  %v5718_v61 = vmov 0  ;;  %v5721_v38 = vperm.slane %v1879_v4, 0 }
  0x7b   : > { %v5710_v16 = vsel %vm2690_vm15, 4294967295, %v5709_v16  ;;  %v5714_v39 = vsel %vm2701_vm5, 4294967295, %v5713_v39  ;;  %v5719_v61 = vsel %vm2710_vm3, 4294967295, %v5718_v61  ;;  %vm2728_vm10 = vcmp.lt.s32.totalorder %v5724_v22, %v1872_v1 }
  0x7c   : > { %5711 = vst [vmem:[#allocation50_spill] sm:$0xff] %v5710_v16  ;;  %vm2721_vm15 = vcmp.lt.s32.totalorder %v5721_v38, %v1879_v4  ;;  %vm5728_vm9 = vcmp.eq.f32.partialorder %v2392_v17, %v1876_v3  ;;  %vm5731_vm3 = vcmp.eq.f32.partialorder %v2010_v19, %v1893_v12  ;;  %v5732_v38 = vmov 0 }
  0x7d   : > { %5715 = vst [vmem:[#allocation51_spill] sm:$0xff] %v5714_v39  ;;  %v5725_v39 = vmov 0  ;;  %vm2737_vm12 = vmand %vm5728_vm9, %vm2597_vm8  ;;  %v5735_v22 = vperm.slane %v2225_v42, 0  ;;  %vm2765_vm8 = vcmp.lt.s32.totalorder %v5739_v43, %v1879_v4  ;;  %vm5749_vm9 = vnez %v5564_v21 }
  0x7e   : > { %5720 = vst [vmem:[#allocation52_spill] sm:$0xff] %v5719_v61  ;;  %v5726_v39 = vsel %vm2728_vm10, 4294967295, %v5725_v39  ;;  %v5729_v61 = vmov 0  ;;  %vm2748_vm5 = vmand %vm5731_vm3, %vm2202_vm11  ;;  %vm5746_vm3 = vcmp.eq.f32.partialorder %v2441_v29, %v1876_v3  ;;  %v5751_v43 = vmov 0 }
  0x7f   : > { %5727 = vst [vmem:[#allocation53_spill] sm:$0xff] %v5726_v39  ;;  %v5730_v61 = vsel %vm2737_vm12, 4294967295, %v5729_v61  ;;  %v5733_v38 = vsel %vm2748_vm5, 4294967295, %v5732_v38  ;;  %vm2754_vm1 = vcmp.ne.s32.totalorder %v5735_v22, 0  ;;  %v5743_v22 = vmov 0  ;;  %vm2781_vm4 = vmand %vm5746_vm3, %vm2609_vm2  ;;  %v5809_v39 = vld [vmem:[#allocation31_spill] sm:$0xff] }
  0x80   : > { %5734 = vst [vmem:[#allocation54_spill] sm:$0xff] %v5733_v38  ;;  %v5737_v51 = vsel %vm2754_vm1, 4294967295, %v5736_v51  ;;  %v5742_v38 = vperm.slane %v1879_v4, 6  ;;  %vm5750_vm1 = vcmp.gt.f32.partialorder %v1973_v57, %v2008_v18  ;;  %vm5753_vm12 = vnez %v5567_v46 }
  0x81   : > { %5738 = vst [vmem:[#allocation55_spill] sm:$0xff] %v5737_v51  ;;  %v5747_v51 = vmov 0  ;;  %vm2790_vm5 = vmor %vm5750_vm1, %vm5749_vm9  ;;  %vm5754_vm0 = vcmp.gt.f32.partialorder %v1976_v58, %v2057_v26  ;;  %vm5758_vm3 = vnez %v5570_v35  ;;  %vm5759_vm2 = vcmp.gt.f32.partialorder %v1989_v63, %v2057_v26 }
  0x82   : > { %vm2772_vm11 = vcmp.lt.s32.totalorder %v5742_v38, %v1872_v1  ;;  %v5748_v51 = vsel %vm2781_vm4, 4294967295, %v5747_v51  ;;  %v5752_v43 = vsel %vm2790_vm5, 4294967295, %v5751_v43  ;;  %vm2799_vm13 = vmor %vm5754_vm0, %vm5753_vm12  ;;  %v5755_v38 = vmov 0 }
  0x83   : > { %v5744_v22 = vsel %vm2772_vm11, 4294967295, %v5743_v22  ;;  %v5756_v38 = vsel %vm2799_vm13, 4294967295, %v5755_v38  ;;  %vm2808_vm4 = vmor %vm5759_vm2, %vm5758_vm3  ;;  %v5760_v57 = vmov 0  ;;  %v5763_v58 = vperm.slane %v1879_v4, 7 }
  0x84   : > { %5745 = vst [vmem:[#allocation56_spill] sm:$0xff] %v5744_v22  ;;  %v5761_v57 = vsel %vm2808_vm4, 4294967295, %v5760_v57  ;;  %vm5767_vm0 = vcmp.eq.f32.partialorder %v2477_v53, %v1876_v3  ;;  %v5768_v63 = vmov 0  ;;  %vm5770_vm1 = vnez %v5589_v23 }
  0x85   : > { %5757 = vst [vmem:[#allocation57_spill] sm:$0xff] %v5756_v38  ;;  %vm2819_vm12 = vcmp.lt.s32.totalorder %v5763_v58, %v1872_v1  ;;  %v5764_v38 = vmov 0  ;;  %vm2828_vm2 = vmand %vm5767_vm0, %vm2675_vm7  ;;  %vm5771_vm4 = vcmp.eq.f32.partialorder %v1987_v62, %v2008_v18  ;;  %v5772_v35 = vmov 0  ;;  %v5784_v1 = vld [vmem:[#allocation28_spill] sm:$0xff] }
  0x86   : > { %5762 = vst [vmem:[#allocation58_spill] sm:$0xff] %v5761_v57  ;;  %v5765_v38 = vsel %vm2819_vm12, 4294967295, %v5764_v38  ;;  %v5769_v63 = vsel %vm2828_vm2, 4294967295, %v5768_v63  ;;  %vm2841_vm13 = vmand %vm5771_vm4, %vm5770_vm1  ;;  %vm5775_vm0 = vcmp.eq.f32.partialorder %v2001_v7, %v2057_v26  ;;  %v5776_v58 = vmov 0 }
  0x87   : > { %5766 = vst [vmem:[#allocation59_spill] sm:$0xff] %v5765_v38  ;;  %v5773_v35 = vsel %vm2841_vm13, 4294967295, %v5772_v35  ;;  %vm2850_vm7 = vmand %vm5775_vm0, %vm2242_vm6  ;;  %vm5785_vm4 = vnez %v5784_v1  ;;  %v5790_v21 = vmov 0  ;;  %v5793_v9 = vrot.slane %v2057_v26, 2 }
  0x88   : > { %5774 = vst [vmem:[#allocation60_spill] sm:$0xff] %v5773_v35  ;;  %v5777_v58 = vsel %vm2850_vm7, 4294967295, %v5776_v58  ;;  %vm5794_vm12 = vcmp.eq.f32.partialorder %v2286_v14, %v2008_v18  ;;  %v5795_v62 = vmov 0  ;;  %vm5798_vm5 = vcmp.eq.f32.partialorder %v2534_v37, %v1876_v3  ;;  %v5815_v35 = vld [vmem:[#allocation32_spill] sm:$0xff] }
  0x89   : > { %5778 = vst [vmem:[#allocation61_spill] sm:$0xff] %v5777_v58  ;;  %v5789_v58 = vperm.slane %v2225_v42, 1  ;;  %v2876_v46 = vperm.slane %v5793_v9, 0  ;;  %vm2885_vm1 = vmand %vm5794_vm12, %vm2721_vm15  ;;  %v5799_v9 = vmov 0  ;;  %v5802_v32 = vmov 0 }
  0x8a   : > { %v5796_v62 = vsel %vm2885_vm1, 4294967295, %v5795_v62  ;;  %v5806_v54 = vmov 0  ;;  %vm5810_vm1 = vnez %v5809_v39  ;;  %vm5816_vm13 = vnez %v5815_v35 }
  0x8b   : > { %vm2870_vm6 = vcmp.ne.s32.totalorder %v5789_v58, 0  ;;  %5797 = vst [vmem:[#allocation63_spill] sm:$0xff] %v5796_v62  ;;  %v5801_v58 = vperm.slane %v1913_v25, 6  ;;  %v5812_v62 = vmov 0  ;;  %v5822_v35 = vmov 0 }
  0x8c   : > { %v5791_v21 = vsel %vm2870_vm6, 4294967295, %v5790_v21  ;;  %vm2894_vm6 = vmand %vm5798_vm5, %vm2728_vm10  ;;  %vm5811_vm5 = vcmp.gt.f32.partialorder %v1991_v0, %v1876_v3  ;;  %v5826_v39 = vmov 0  ;;  %v5850_v22 = vmov 0  }
  0x8d   : > { %5792 = vst [vmem:[#allocation62_spill] sm:$0xff] %v5791_v21  ;;  %v5800_v9 = vsel %vm2894_vm6, 4294967295, %v5799_v9  ;;  %vm2900_vm0 = vcmp.ne.s32.totalorder %v5801_v58, 0  ;;  %v5805_v21 = vperm.slane %v1930_v34, 4  ;;  %vm2915_vm10 = vmor %vm5811_vm5, %vm5810_vm1  ;;  %v5818_v58 = vmov 0 }
  0x8e   : > { %v5803_v32 = vsel %vm2900_vm0, 4294967295, %v5802_v32  ;;  %v5813_v62 = vsel %vm2915_vm10, 4294967295, %v5812_v62  ;;  %vm5817_vm0 = vcmp.gt.f32.partialorder %v2001_v7, %v1893_v12  ;;  %vm5821_vm5 = vcmp.eq.f32.partialorder %v2288_v24, %v2008_v18 }
  0x8f   : > { %5804 = vst [vmem:[#allocation64_spill] sm:$0xff] %v5803_v32  ;;  %vm2906_vm12 = vcmp.ne.s32.totalorder %v5805_v21, 0  ;;  %vm2924_vm2 = vmor %vm5817_vm0, %vm5816_vm13  ;;  %vm5825_vm13 = vcmp.eq.f32.partialorder %v2590_v56, %v1876_v3  ;;  %v5832_v32 = vrot.slane %v2057_v26, 3  ;;  %vm5833_vm1 = vnez %v5765_v38  ;;  %v5845_v38 = vld [vmem:[#allocation35_spill] sm:$0xff] }
  0x90   : > { %v5807_v54 = vsel %vm2906_vm12, 4294967295, %v5806_v54  ;;  %5814 = vst [vmem:[#allocation31_spill] sm:$0xff] %v5813_v62  ;;  %v5819_v58 = vsel %vm2924_vm2, 4294967295, %v5818_v58  ;;  %vm2939_vm10 = vmand %vm5821_vm5, %vm2765_vm8  ;;  %vm5838_vm5 = vcmp.eq.f32.partialorder %v2012_v20, %v1893_v12  ;;  %v5843_v21 = vmov 0 }
  0x91   : > { %5808 = vst [vmem:[#allocation65_spill] sm:$0xff] %v5807_v54  ;;  %v5823_v35 = vsel %vm2939_vm10, 4294967295, %v5822_v35  ;;  %vm2948_vm0 = vmand %vm5825_vm13, %vm2772_vm11  ;;  %v5828_v54 = vperm.slane %v2225_v42, 2  ;;  %vm5834_vm11 = vcmp.eq.f32.partialorder %v2602_v10, %v1876_v3  ;;  %vm5837_vm10 = vnez %v5541_v49 }
  0x92   : > { %5820 = vst [vmem:[#allocation32_spill] sm:$0xff] %v5819_v58  ;;  %v5827_v39 = vsel %vm2948_vm0, 4294967295, %v5826_v39  ;;  %v5829_v58 = vmov 0  ;;  %vm2972_vm0 = vmand %vm5834_vm11, %vm5833_vm1  ;;  %vm5841_vm13 = vnez %v5616_v28  ;;  %vm5842_vm11 = vcmp.gt.f32.partialorder %v1983_v60, %v2008_v18 }
  0x93   : > { %5824 = vst [vmem:[#allocation66_spill] sm:$0xff] %v5823_v35  ;;  %vm2955_vm12 = vcmp.ne.s32.totalorder %v5828_v54, 0  ;;  %v2961_v35 = vperm.slane %v5832_v32, 0  ;;  %v5835_v54 = vmov 0  ;;  %vm2983_vm2 = vmand %vm5838_vm5, %vm5837_vm10  ;;  %v5839_v32 = vmov 0 }
  0x94   : > { %v5830_v58 = vsel %vm2955_vm12, 4294967295, %v5829_v58  ;;  %v5836_v54 = vsel %vm2972_vm0, 4294967295, %v5835_v54  ;;  %v5840_v32 = vsel %vm2983_vm2, 4294967295, %v5839_v32  ;;  %vm2992_vm1 = vmor %vm5842_vm11, %vm5841_vm13  ;;  %vm5846_vm12 = vnez %v5845_v38  ;;  %v5876_v38 = vld [vmem:[#allocation38_spill] sm:$0xff] }
  0x95   : > { %5831 = vst [vmem:[#allocation67_spill] sm:$0xff] %v5830_v58  ;;  %v5844_v21 = vsel %vm2992_vm1, 4294967295, %v5843_v21  ;;  %vm5847_vm0 = vcmp.gt.f32.partialorder %v1995_v6, %v2057_v26  ;;  %v5848_v49 = vmov 0  ;;  %vm5851_vm10 = vnez %v5515_v31 }
  0x96   : > { %vm3001_vm3 = vmor %vm5847_vm0, %vm5846_vm12  ;;  %vm5852_vm5 = vnez %v5561_v27  ;;  %vm5854_vm13 = vnez %v5523_v36  ;;  %vm5855_vm11 = vnez %v5574_v52  ;;  %vm5858_vm9 = vcmp.eq.f32.partialorder %v2664_v50, %v1893_v12 }
  0x97   : > { %v5849_v49 = vsel %vm3001_vm3, 4294967295, %v5848_v49  ;;  %vm5853_vm2 = vmand %vm5851_vm10, %vm5852_vm5  ;;  %vm5857_vm3 = vnez %v5628_v59  ;;  %v5859_v6 = vmov 0  ;;  %vm5863_vm12 = vcmp.eq.f32.partialorder %v1991_v0, %v2008_v18  ;;  %v5873_v59 = vld [vmem:[#allocation37_spill] sm:$0xff] }
  0x98   : > { %v482_v60 = vsel %vm5853_vm2, 1, %v5850_v22  ;;  %vm5856_vm1 = vmand %vm5854_vm13, %vm5855_vm11  ;;  %vm5862_vm11 = vnez %v5639_v30  ;;  %v5864_v27 = vmov 0  ;;  %v5869_v52 = vmov 0 }
  0x99   : > { %v484_v28 = vsel %vm5856_vm1, 1, %v5850_v22  ;;  %vm3026_vm5 = vmand %vm5858_vm9, %vm5857_vm3  ;;  %vm5867_vm9 = vnez %v5589_v23  ;;  %vm5868_vm3 = vcmp.eq.f32.partialorder %v2003_v13, %v2057_v26  ;;  %v5878_v23 = vperm.slane %v2225_v42, 3 }
  0x9a   : > { %v5860_v6 = vsel %vm3026_vm5, 4294967295, %v5859_v6  ;;  %vm3039_vm0 = vmand %vm5863_vm12, %vm5862_vm11  ;;  %vm5883_vm14 = vcmp.eq.f32.partialorder %v2664_v50, %v2057_v26  ;;  %vm5887_vm6 = vcmp.gt.f32.partialorder %v2286_v14, %v1876_v3  ;;  %v5890_v0 = vperm.slane %v1913_v25, 7 }
  0x9b   : > { %5861 = vst [vmem:[#allocation35_spill] sm:$0xff] %v5860_v6  ;;  %v5865_v27 = vsel %vm3039_vm0, 4294967295, %v5864_v27  ;;  %vm3048_vm5 = vmand %vm5868_vm3, %vm5867_vm9  ;;  %vm3063_vm0 = vcmp.ne.s32.totalorder %v5878_v23, 0  ;;  %v5884_v23 = vmov 0  ;;  %v5891_v16 = vmov 0 }
  0x9c   : > { %5866 = vst [vmem:[#allocation68_spill] sm:$0xff] %v5865_v27  ;;  %v5870_v52 = vsel %vm3048_vm5, 4294967295, %v5869_v52  ;;  %v5879_v27 = vmov 0  ;;  %vm3080_vm7 = vmand %vm5883_vm14, %vm2721_vm15  ;;  %vm3095_vm9 = vcmp.ne.s32.totalorder %v5890_v0, 0  ;;  %v5895_v45 = vmov 0  ;;  %v6034_v0 = vld [vmem:[#allocation19_spill] sm:$0xff] }
  0x9d   : > { %5871 = vst [vmem:[#allocation69_spill] sm:$0xff] %v5870_v52  ;;  %v5880_v27 = vsel %vm3063_vm0, 4294967295, %v5879_v27  ;;  %v5882_v52 = vrot.slane %v2057_v26, 4  ;;  %v5885_v23 = vsel %vm3080_vm7, 4294967295, %v5884_v23  ;;  %vm5886_vm0 = vnez %v5681_v55 }
  0x9e   : > { %5881 = vst [vmem:[#allocation37_spill] sm:$0xff] %v5880_v27  ;;  %vm3089_vm1 = vmor %vm5887_vm6, %vm5886_vm0  ;;  %v5892_v16 = vsel %vm3095_vm9, 4294967295, %v5891_v16  ;;  %v5894_v27 = vperm.slane %v1930_v34, 5  ;;  %vm5898_vm14 = vnez %v5655_v44  ;;  %vm5899_vm6 = vcmp.gt.f32.partialorder %v1993_v2, %v1876_v3  ;;  %v6080_v44 = vld [vmem:[#allocation66_spill] sm:$0xff] }
  0x9f   : > { %v3069_v6 = vperm.slane %v5882_v52, 0  ;;  %5893 = vst [vmem:[#allocation38_spill] sm:$0xff] %v5892_v16  ;;  %vm3110_vm0 = vmor %vm5899_vm6, %vm5898_vm14  ;;  %v5900_v55 = vmov 0  ;;  %vm5903_vm3 = vnez %v5658_v41  ;;  %vm5904_vm9 = vcmp.gt.f32.partialorder %v2003_v13, %v1893_v12 }
  0xa0   : > { %vm3101_vm15 = vcmp.ne.s32.totalorder %v5894_v27, 0  ;;  %v5901_v55 = vsel %vm3110_vm0, 4294967295, %v5900_v55  ;;  %vm3119_vm7 = vmor %vm5904_vm9, %vm5903_vm3  ;;  %v5905_v25 = vmov 0  ;;  %v5912_v41 = vperm.slane %v1879_v4, 2 }
  0xa1   : > { %v5896_v45 = vsel %vm3101_vm15, 4294967295, %v5895_v45  ;;  %5902 = vst [vmem:[#allocation71_spill] sm:$0xff] %v5901_v55  ;;  %v5906_v25 = vsel %vm3119_vm7, 4294967295, %v5905_v25  ;;  %vm5915_vm2 = vnez %v5651_v15  ;;  %vm5916_vm14 = vcmp.eq.f32.partialorder %v2668_v11, %v1893_v12 }
  0xa2   : > { %5897 = vst [vmem:[#allocation70_spill] sm:$0xff] %v5896_v45  ;;  %vm3139_vm3 = vcmp.lt.s32.totalorder %v5912_v41, %v1879_v4  ;;  %vm3148_vm5 = vmand %vm5916_vm14, %vm5915_vm2  ;;  %v5917_v27 = vmov 0  ;;  %vm5920_vm6 = vnez %v5707_v8  ;;  %vm5921_vm9 = vcmp.gt.f32.partialorder %v2288_v24, %v1876_v3 }
  0xa3   : > { %5907 = vst [vmem:[#allocation72_spill] sm:$0xff] %v5906_v25  ;;  %v5918_v27 = vsel %vm3148_vm5, 4294967295, %v5917_v27  ;;  %vm3157_vm13 = vmor %vm5921_vm9, %vm5920_vm6  ;;  %v514_v41 = vadd.s32 %v484_v28, %v482_v60  ;;  %v5924_v36 = vperm.slane %v2225_v42, 4  ;;  %v5925_v15 = vmov 0  ;;  %v5938_v60 = vld [vmem:[#allocation46_spill] sm:$0xff] }
  0xa4   : > { %5919 = vst [vmem:[#allocation73_spill] sm:$0xff] %v5918_v27  ;;  %v5928_v31 = vrot.slane %v2057_v26, 5  ;;  %v5929_v8 = vrot.slane %v2057_v26, 6  ;;  %vm5930_vm14 = vcmp.eq.f32.partialorder %v2668_v11, %v2057_v26  ;;  %vm5934_vm9 = vnez %v5730_v61  ;;  %v5940_v28 = vld [vmem:[#allocation18_spill] sm:$0xff] }
  0xa5   : > { %vm3163_vm15 = vcmp.ne.s32.totalorder %v5924_v36, 0  ;;  %vm3182_vm6 = vmand %vm5930_vm14, %vm2765_vm8  ;;  %v5931_v36 = vmov 0  ;;  %vm5939_vm2 = vnez %v5938_v60  ;;  %vm5941_vm10 = vcmp.gt.f32.partialorder %v5940_v28, %v2008_v18  ;;  %v5955_v60 = vld [vmem:[#allocation26_spill] sm:$0xff] }
  0xa6   : > { %v5926_v15 = vsel %vm3163_vm15, 4294967295, %v5925_v15  ;;  %v3169_v45 = vperm.slane %v5928_v31, 0  ;;  %v3173_v27 = vperm.slane %v5929_v8, 0  ;;  %v5932_v36 = vsel %vm3182_vm6, 4294967295, %v5931_v36  ;;  %vm3200_vm7 = vmor %vm5941_vm10, %vm5939_vm2  ;;  %v5945_v8 = vld [vmem:[#allocation47_spill] sm:$0xff]  ;;  %v5957_v28 = vld [vmem:[#allocation30_spill] sm:$0xff] }
  0xa7   : > { %5927 = vst [vmem:[#allocation74_spill] sm:$0xff] %v5926_v15  ;;  %vm5935_vm15 = vcmp.gt.f32.partialorder %v2392_v17, %v1876_v3  ;;  %v5936_v31 = vmov 0  ;;  %v5942_v19 = vmov 0  ;;  %vm5946_vm8 = vnez %v5945_v8 }
  0xa8   : > { %5933 = vst [vmem:[#allocation75_spill] sm:$0xff] %v5932_v36  ;;  %vm3191_vm5 = vmor %vm5935_vm15, %vm5934_vm9  ;;  %v5943_v19 = vsel %vm3200_vm7, 4294967295, %v5942_v19  ;;  %vm5947_vm14 = vcmp.gt.f32.partialorder %v1999_v5, %v2057_v26  ;;  %v5948_v61 = vmov 0  ;;  %vm5956_vm10 = vnez %v5955_v60  ;;  %v5961_v5 = vld [vmem:[#allocation43_spill] sm:$0xff] }
  0xa9   : > { %v5937_v31 = vsel %vm3191_vm5, 4294967295, %v5936_v31  ;;  %5944 = vst [vmem:[#allocation46_spill] sm:$0xff] %v5943_v19  ;;  %vm3209_vm6 = vmor %vm5947_vm14, %vm5946_vm8  ;;  %vm5958_vm2 = vnez %v5957_v28  ;;  %v5960_v8 = vrot.slane %v2057_v26, 7  ;;  %vm5963_vm0 = vcmp.eq.f32.partialorder %v2876_v46, %v1893_v12 }
  0xaa   : > { %v5949_v61 = vsel %vm3209_vm6, 4294967295, %v5948_v61  ;;  %vm5959_vm7 = vmand %vm5956_vm10, %vm5958_vm2  ;;  %vm5962_vm6 = vnez %v5961_v5  ;;  %v5964_v15 = vmov 0  ;;  %vm5968_vm2 = vcmp.gt.f32.partialorder %v2441_v29, %v1876_v3  ;;  %v5972_v5 = vld [vmem:[#allocation51_spill] sm:$0xff] }
  0xab   : > { %5950 = vst [vmem:[#allocation18_spill] sm:$0xff] %v5949_v61  ;;  %v486_v19 = vsel %vm5959_vm7, 1, %v5850_v22  ;;  %v3225_v25 = vperm.slane %v5960_v8, 0  ;;  %vm3236_vm15 = vmand %vm5963_vm0, %vm5962_vm6  ;;  %vm5967_vm7 = vnez %v5748_v51  ;;  %v5969_v28 = vmov 0  ;;  %v5971_v8 = vld [vmem:[#allocation22_spill] sm:$0xff] }
  0xac   : > { %v5965_v15 = vsel %vm3236_vm15, 4294967295, %v5964_v15  ;;  %vm3245_vm9 = vmor %vm5968_vm2, %vm5967_vm7  ;;  %vm5973_vm0 = vnez %v5972_v5  ;;  %vm5974_vm6 = vcmp.eq.f32.partialorder %v1993_v2, %v2008_v18  ;;  %v5975_v51 = vmov 0  ;;  %v5983_v61 = vld [vmem:[#allocation50_spill] sm:$0xff] }
  0xad   : > { %5966 = vst [vmem:[#allocation47_spill] sm:$0xff] %v5965_v15  ;;  %v5970_v28 = vsel %vm3245_vm9, 4294967295, %v5969_v28  ;;  %vm3258_vm15 = vmand %vm5974_vm6, %vm5973_vm0  ;;  %vm5977_vm7 = vcmp.eq.f32.partialorder %v5971_v8, %v2057_v26  ;;  %v5978_v15 = vmov 0  ;;  %v5985_v5 = vperm.slane %v2225_v42, 5 }
  0xae   : > { %v5976_v51 = vsel %vm3258_vm15, 4294967295, %v5975_v51  ;;  %vm3267_vm2 = vmand %vm5977_vm7, %vm5862_vm11  ;;  %v5986_v2 = vmov 0  ;;  %vm5989_vm9 = vcmp.eq.f32.partialorder %v2392_v17, %v2008_v18  ;;  %v5990_v30 = vmov 0 }
  0xaf   : > { %v5979_v15 = vsel %vm3267_vm2, 4294967295, %v5978_v15  ;;  %vm3277_vm6 = vcmp.ne.s32.totalorder %v5985_v5, 0  ;;  %vm3294_vm14 = vmand %vm5989_vm9, %vm3139_vm3  ;;  %vm5992_vm0 = vnez %v5769_v63  ;;  %vm5993_vm11 = vcmp.gt.f32.partialorder %v2477_v53, %v1876_v3 }
  0xb0   : > { %5980 = vst [vmem:[#allocation26_spill] sm:$0xff] %v5979_v15  ;;  %v5987_v2 = vsel %vm3277_vm6, 4294967295, %v5986_v2  ;;  %v5991_v30 = vsel %vm3294_vm14, 4294967295, %v5990_v30  ;;  %vm3303_vm6 = vmor %vm5993_vm11, %vm5992_vm0  ;;  %v5994_v5 = vmov 0  ;;  %v5997_v36 = vmov 0  ;;  %v6000_v15 = vld [vmem:[#allocation54_spill] sm:$0xff] }
  0xb1   : > { %5988 = vst [vmem:[#allocation30_spill] sm:$0xff] %v5987_v2  ;;  %v5995_v5 = vsel %vm3303_vm6, 4294967295, %v5994_v5  ;;  %v5996_v2 = vperm.slane %v1930_v34, 6  ;;  %vm6001_vm9 = vnez %v6000_v15  ;;  %vm6002_vm2 = vcmp.gt.f32.partialorder %v5971_v8, %v1893_v12  ;;  %v6127_v15 = vld [vmem:[#allocation20_spill] sm:$0xff] }
  0xb2   : > { %vm3318_vm14 = vmor %vm6002_vm2, %vm6001_vm9  ;;  %v6003_v63 = vmov 0  ;;  %vm6009_vm2 = vnez %v5678_v47  ;;  %vm6010_vm9 = vcmp.eq.f32.partialorder %v2961_v35, %v1893_v12  ;;  %v515_v47 = vadd.s32 %v514_v41, %v486_v19 }
  0xb3   : > { %vm3309_vm7 = vcmp.ne.s32.totalorder %v5996_v2, 0  ;;  %v6004_v63 = vsel %vm3318_vm14, 4294967295, %v6003_v63  ;;  %v6006_v2 = vperm.slane %v1879_v4, 3  ;;  %vm3340_vm14 = vmand %vm6010_vm9, %vm6009_vm2  ;;  %vm6019_vm9 = vnez %v5787_v48  ;;  %v6067_v48 = vld [vmem:[#allocation62_spill] sm:$0xff] }
  0xb4   : > { %v5998_v36 = vsel %vm3309_vm7, 4294967295, %v5997_v36  ;;  %6005 = vst [vmem:[#allocation22_spill] sm:$0xff] %v6004_v63  ;;  %v6013_v63 = vld [vmem:[#allocation55_spill] sm:$0xff]  ;;  %v6020_v52 = vperm.slane %v2225_v42, 6  ;;  %vm6024_vm12 = vcmp.eq.f32.partialorder %v2876_v46, %v2057_v26  ;;  %v6025_v57 = vmov 0 }
  0xb5   : > { %5999 = vst [vmem:[#allocation43_spill] sm:$0xff] %v5998_v36  ;;  %vm3331_vm7 = vcmp.lt.s32.totalorder %v6006_v2, %v1879_v4  ;;  %v6011_v36 = vmov 0  ;;  %vm6014_vm11 = vnez %v6013_v63  ;;  %v6021_v63 = vmov 0  ;;  %v6045_v2 = vld [vmem:[#allocation27_spill] sm:$0xff] }
  0xb6   : > { %v6012_v36 = vsel %vm3340_vm14, 4294967295, %v6011_v36  ;;  %vm808_vm0 = vmand %vm6014_vm11, %vm3089_vm1  ;;  %vm3362_vm5 = vcmp.ne.s32.totalorder %v6020_v52, 0  ;;  %vm6028_vm14 = vnez %v5800_v9  ;;  %v6032_v52 = vld [vmem:[#allocation60_spill] sm:$0xff]  ;;  %vm6035_vm8 = vcmp.gt.f32.partialorder %v6034_v0, %v2008_v18 }
  0xb7   : > { %v6022_v63 = vsel %vm3362_vm5, 4294967295, %v6021_v63  ;;  %vm3375_vm11 = vmand %vm6024_vm12, %vm3139_vm3  ;;  %vm6029_vm5 = vcmp.gt.f32.partialorder %v2534_v37, %v1876_v3  ;;  %v840_v19 = vsel %vm808_vm0, 1, %v5850_v22  ;;  %vm6033_vm1 = vnez %v6032_v52  ;;  %v6047_v52 = vld [vmem:[#allocation33_spill] sm:$0xff] }
  0xb8   : > { %6023 = vst [vmem:[#allocation50_spill] sm:$0xff] %v6022_v63  ;;  %v6026_v57 = vsel %vm3375_vm11, 4294967295, %v6025_v57  ;;  %vm3384_vm2 = vmor %vm6029_vm5, %vm6028_vm14  ;;  %v6036_v63 = vmov 0  ;;  %vm6041_vm11 = vcmp.gt.f32.partialorder %v2001_v7, %v2057_v26  ;;  %v6042_v9 = vmov 0  ;;  %v6053_v7 = vld [vmem:[#allocation36_spill] sm:$0xff] }
  0xb9   : > { %6027 = vst [vmem:[#allocation54_spill] sm:$0xff] %v6026_v57  ;;  %vm3394_vm12 = vmor %vm6035_vm8, %vm6033_vm1  ;;  %v6039_v57 = vld [vmem:[#allocation61_spill] sm:$0xff]  ;;  %vm6046_vm14 = vnez %v6045_v2  ;;  %vm6048_vm0 = vnez %v6047_v52  ;;  %v6059_v1 = vmov 0  ;;  %vm6081_vm15 = vnez %v6080_v44 }
  0xba   : > { %v6037_v63 = vsel %vm3394_vm12, 4294967295, %v6036_v63  ;;  %vm6040_vm3 = vnez %v6039_v57  ;;  %vm6049_vm6 = vmand %vm6046_vm14, %vm6048_vm0  ;;  %v6056_v52 = vld [vmem:[#allocation49_spill] sm:$0xff]  ;;  %v6105_v62 = vmov 0  ;;  %v6170_v55 = vperm.slane %v2270_v40, 1 }
  0xbb   : > { %6038 = vst [vmem:[#allocation60_spill] sm:$0xff] %v6037_v63  ;;  %vm3403_vm5 = vmor %vm6041_vm11, %vm6040_vm3  ;;  %v488_v0 = vsel %vm6049_vm6, 1, %v5850_v22  ;;  %v6050_v63 = vld [vmem:[#allocation34_spill] sm:$0xff]  ;;  %vm6054_vm11 = vnez %v6053_v7  ;;  %vm6057_vm0 = vnez %v6056_v52  ;;  %vm6058_vm6 = vcmp.eq.f32.partialorder %v3069_v6, %v1893_v12  ;;  %v6070_v52 = vld [vmem:[#allocation64_spill] sm:$0xff] }
  0xbc   : > { %v6043_v9 = vsel %vm3403_vm5, 4294967295, %v6042_v9  ;;  %vm6051_vm8 = vnez %v6050_v63  ;;  %vm6055_vm3 = vmand %vm6019_vm9, %vm6054_vm11  ;;  %v6062_v63 = vld [vmem:[#allocation63_spill] sm:$0xff]  ;;  %v6065_v7 = vmov 0  ;;  %vm6068_vm11 = vnez %v6067_v48  ;;  %v6093_v44 = vld [vmem:[#allocation53_spill] sm:$0xff] }
  0xbd   : > { %6044 = vst [vmem:[#allocation19_spill] sm:$0xff] %v6043_v9  ;;  %vm6052_vm1 = vmand %vm5785_vm4, %vm6051_vm8  ;;  %v500_v9 = vsel %vm6055_vm3, 1, %v5850_v22  ;;  %vm6063_vm8 = vnez %v6062_v63  ;;  %v6074_v63 = vld [vmem:[#allocation65_spill] sm:$0xff]  ;;  %v6083_v48 = vmov 0  ;;  %vm6103_vm5 = vnez %v5830_v58  ;;  %v6162_v58 = vld [vmem:[#allocation40_spill] sm:$0xff] }
  0xbe   : > { %v498_v57 = vsel %vm6052_vm1, 1, %v5850_v22  ;;  %vm3432_vm12 = vmand %vm6058_vm6, %vm6057_vm0  ;;  %vm6064_vm1 = vcmp.gt.f32.partialorder %v2286_v14, %v2008_v18  ;;  %v6077_v14 = vmov 0  ;;  %v6253_v41 = vmov 0 }
  0xbf   : > { %v6060_v1 = vsel %vm3432_vm12, 4294967295, %v6059_v1  ;;  %vm3441_vm4 = vmor %vm6064_vm1, %vm6063_vm8  ;;  %vm6082_vm8 = vcmp.gt.f32.partialorder %v2288_v24, %v2008_v18  ;;  %vm6086_vm1 = vnez %v5827_v39  ;;  %v6090_v24 = vperm.slane %v1879_v4, 4  ;;  %v6221_v39 = vld [vmem:[#allocation21_spill] sm:$0xff] }
  0xc0   : > { %6061 = vst [vmem:[#allocation61_spill] sm:$0xff] %v6060_v1  ;;  %v6066_v7 = vsel %vm3441_vm4, 4294967295, %v6065_v7  ;;  %vm810_vm3 = vmand %vm6068_vm11, %vm3157_vm13  ;;  %vm6076_vm13 = vcmp.eq.f32.partialorder %v2441_v29, %v2008_v18  ;;  %vm6087_vm4 = vcmp.gt.f32.partialorder %v2590_v56, %v1876_v3  ;;  %v6088_v1 = vmov 0 }
  0xc1   : > { %vm3468_vm6 = vmand %vm6076_vm13, %vm3331_vm7  ;;  %v6096_v56 = vmov 0  ;;  %vm6099_vm13 = vcmp.gt.f32.partialorder %v2602_v10, %v1876_v3  ;;  %v6109_v3 = vmov 0  ;;  %v6171_v10 = vmov 0 }
  0xc2   : > { %v6078_v14 = vsel %vm3468_vm6, 4294967295, %v6077_v14  ;;  %vm3477_vm11 = vmor %vm6082_vm8, %vm6081_vm15  ;;  %vm3498_vm8 = vcmp.lt.s32.totalorder %v6090_v24, %v1879_v4  ;;  %vm6102_vm6 = vnez %v5937_v31  ;;  %v6115_v31 = vmov 0 }
  0xc3   : > { %6079 = vst [vmem:[#allocation27_spill] sm:$0xff] %v6078_v14  ;;  %v6084_v48 = vsel %vm3477_vm11, 4294967295, %v6083_v48  ;;  %vm3486_vm12 = vmor %vm6087_vm4, %vm6086_vm1  ;;  %v842_v14 = vsel %vm810_vm3, 1, %v5850_v22  ;;  %vm6094_vm4 = vnez %v6093_v44  ;;  %vm6095_vm1 = vcmp.eq.f32.partialorder %v3169_v45, %v1893_v12 }
  0xc4   : > { %6085 = vst [vmem:[#allocation33_spill] sm:$0xff] %v6084_v48  ;;  %v6089_v1 = vsel %vm3486_vm12, 4294967295, %v6088_v1  ;;  %vm3507_vm11 = vmand %vm6095_vm1, %vm6094_vm4  ;;  %vm6098_vm3 = vnez %v5836_v54  ;;  %v6100_v48 = vmov 0  ;;  %v872_v24 = vadd.s32 %v842_v14, %v840_v19 }
  0xc5   : > { %v6097_v56 = vsel %vm3507_vm11, 4294967295, %v6096_v56  ;;  %vm3516_vm15 = vmor %vm6099_vm13, %vm6098_vm3  ;;  %v6104_v44 = vperm.slane %v1930_v34, 7  ;;  %vm6107_vm1 = vnez %v5840_v32  ;;  %vm6108_vm13 = vcmp.gt.f32.partialorder %v2012_v20, %v1893_v12  ;;  %v6318_v20 = vld [vmem:[#allocation62_spill] sm:$0xff] }
  0xc6   : > { %v6101_v48 = vsel %vm3516_vm15, 4294967295, %v6100_v48  ;;  %vm812_vm0 = vmand %vm6103_vm5, %vm6102_vm6  ;;  %vm6113_vm11 = vnez %v5876_v38  ;;  %v516_v34 = vadd.s32 %v515_v47, %v488_v0  ;;  %v528_v54 = vadd.s32 %v500_v9, %v498_v57  ;;  %v6120_v47 = vld [vmem:[#allocation35_spill] sm:$0xff]  ;;  %v6125_v57 = vld [vmem:[#allocation68_spill] sm:$0xff] }
  0xc7   : > { %vm3526_vm4 = vcmp.ne.s32.totalorder %v6104_v44, 0  ;;  %vm3535_vm3 = vmor %vm6108_vm13, %vm6107_vm1  ;;  %v6114_v32 = vperm.slane %v2270_v40, 0  ;;  %vm6117_vm13 = vcmp.eq.f32.partialorder %v2961_v35, %v2057_v26  ;;  %v6118_v19 = vmov 0  ;;  %v6131_v44 = vld [vmem:[#allocation69_spill] sm:$0xff] }
  0xc8   : > { %v6106_v62 = vsel %vm3526_vm4, 4294967295, %v6105_v62  ;;  %v6110_v3 = vsel %vm3535_vm3, 4294967295, %v6109_v3  ;;  %vm3560_vm6 = vmand %vm6117_vm13, %vm3331_vm7  ;;  %vm6121_vm9 = vnez %v6120_v47  ;;  %vm6122_vm5 = vcmp.gt.f32.partialorder %v2664_v50, %v1893_v12 }
  0xc9   : > { %vm3549_vm4 = vcmp.ne.s32.totalorder %v6114_v32, 0  ;;  %v6119_v19 = vsel %vm3560_vm6, 4294967295, %v6118_v19  ;;  %vm3569_vm15 = vmor %vm6122_vm5, %vm6121_vm9  ;;  %v6123_v9 = vmov 0  ;;  %v844_v0 = vsel %vm812_vm0, 1, %v5850_v22 }
  0xca   : > { %v6116_v31 = vsel %vm3549_vm4, 4294967295, %v6115_v31  ;;  %v6124_v9 = vsel %vm3569_vm15, 4294967295, %v6123_v9  ;;  %vm6126_vm1 = vnez %v6125_v57  ;;  %vm6128_vm4 = vcmp.gt.f32.partialorder %v6127_v15, %v2008_v18  ;;  %v6139_v57 = vld [vmem:[#allocation39_spill] sm:$0xff] }
  0xcb   : > { %vm3579_vm7 = vmor %vm6128_vm4, %vm6126_vm1  ;;  %v6129_v14 = vmov 0  ;;  %vm6132_vm13 = vnez %v6131_v44  ;;  %vm6133_vm6 = vcmp.gt.f32.partialorder %v2003_v13, %v2057_v26  ;;  %v6134_v32 = vmov 0  ;;  %v6142_v13 = vld [vmem:[#allocation56_spill] sm:$0xff] }
  0xcc   : > { %v6130_v14 = vsel %vm3579_vm7, 4294967295, %v6129_v14  ;;  %vm3588_vm9 = vmor %vm6133_vm6, %vm6132_vm13  ;;  %vm6136_vm5 = vnez %v5873_v59  ;;  %vm6137_vm0 = vnez %v5643_v33  ;;  %vm6140_vm4 = vnez %v6139_v57  ;;  %v6152_v57 = vld [vmem:[#allocation37_spill] sm:$0xff] }
  0xcd   : > { %v6135_v32 = vsel %vm3588_vm9, 4294967295, %v6134_v32  ;;  %vm6138_vm15 = vmand %vm6136_vm5, %vm6137_vm0  ;;  %vm6143_vm13 = vnez %v6142_v13  ;;  %vm6144_vm9 = vcmp.eq.f32.partialorder %v3173_v27, %v1893_v12  ;;  %v6145_v44 = vmov 0 }
  0xce   : > { %v490_v47 = vsel %vm6138_vm15, 1, %v5850_v22  ;;  %vm6141_vm1 = vmand %vm6113_vm11, %vm6140_vm4  ;;  %vm6147_vm15 = vnez %v5885_v23  ;;  %vm6148_vm0 = vcmp.gt.f32.partialorder %v2664_v50, %v2057_v26  ;;  %v6149_v33 = vmov 0  ;;  %v6158_v23 = vld [vmem:[#allocation70_spill] sm:$0xff]  ;;  %v6160_v50 = vld [vmem:[#allocation24_spill] sm:$0xff] }
  0xcf   : > { %v502_v15 = vsel %vm6141_vm1, 1, %v5850_v22  ;;  %vm3611_vm7 = vmand %vm6144_vm9, %vm6143_vm13  ;;  %vm6151_vm4 = vnez %v5970_v28  ;;  %vm6153_vm1 = vnez %v6152_v57  ;;  %v873_v13 = vadd.s32 %v872_v24, %v844_v0  ;;  %v6165_v57 = vld [vmem:[#allocation25_spill] sm:$0xff] }
  0xd0   : > { %v6146_v44 = vsel %vm3611_vm7, 4294967295, %v6145_v44  ;;  %vm3620_vm14 = vmor %vm6148_vm0, %vm6147_vm15  ;;  %vm6155_vm13 = vnez %v5892_v16  ;;  %vm6159_vm3 = vnez %v6158_v23  ;;  %vm6161_vm15 = vnez %v6160_v50  ;;  %v6167_v24 = vld [vmem:[#allocation41_spill] sm:$0xff]  ;;  %v6199_v16 = vld [vmem:[#allocation46_spill] sm:$0xff] }
  0xd1   : > { %v6150_v33 = vsel %vm3620_vm14, 4294967295, %v6149_v33  ;;  %vm814_vm6 = vmand %vm6153_vm1, %vm6151_vm4  ;;  %vm6163_vm0 = vnez %v6162_v58  ;;  %vm6166_vm4 = vnez %v6165_v57  ;;  %vm6168_vm1 = vnez %v6167_v24  ;;  %v6178_v57 = vld [vmem:[#allocation73_spill] sm:$0xff]  ;;  %v6184_v24 = vld [vmem:[#allocation59_spill] sm:$0xff] }
  0xd2   : > { %vm6164_vm14 = vmand %vm6161_vm15, %vm6163_vm0  ;;  %vm3650_vm7 = vcmp.ne.s32.totalorder %v6170_v55, 0  ;;  %v6175_v58 = vmov 0  ;;  %v6181_v55 = vmov 0  ;;  %v846_v50 = vsel %vm814_vm6, 1, %v5850_v22 }
  0xd3   : > { %v483_v28 = vsel %vm6164_vm14, 1, %v5850_v22  ;;  %vm6169_vm10 = vmand %vm6166_vm4, %vm6168_vm1  ;;  %v6172_v10 = vsel %vm3650_vm7, 4294967295, %v6171_v10  ;;  %vm6174_vm14 = vcmp.eq.f32.partialorder %v2477_v53, %v2008_v18  ;;  %vm6180_vm1 = vcmp.gt.f32.partialorder %v2668_v11, %v1893_v12 }
  0xd4   : > { %v485_v0 = vsel %vm6169_vm10, 1, %v5850_v22  ;;  %6173 = vst [vmem:[#allocation34_spill] sm:$0xff] %v6172_v10  ;;  %vm3661_vm15 = vmand %vm6174_vm14, %vm3498_vm8  ;;  %vm6179_vm10 = vnez %v6178_v57  ;;  %vm6185_vm7 = vnez %v6184_v24  ;;  %v6187_v57 = vmov 0  ;;  %v6190_v10 = vld [vmem:[#allocation75_spill] sm:$0xff] }
  0xd5   : > { %v6176_v58 = vsel %vm3661_vm15, 4294967295, %v6175_v58  ;;  %vm3670_vm0 = vmor %vm6180_vm1, %vm6179_vm10  ;;  %vm6186_vm15 = vcmp.eq.f32.partialorder %v3225_v25, %v1893_v12  ;;  %vm6191_vm6 = vnez %v6190_v10  ;;  %vm6192_vm1 = vcmp.gt.f32.partialorder %v2668_v11, %v2057_v26  ;;  %v6204_v10 = vld [vmem:[#allocation45_spill] sm:$0xff]  ;;  %v6206_v11 = vld [vmem:[#allocation48_spill] sm:$0xff] }
  0xd6   : > { %6177 = vst [vmem:[#allocation36_spill] sm:$0xff] %v6176_v58  ;;  %v6182_v55 = vsel %vm3670_vm0, 4294967295, %v6181_v55  ;;  %vm3686_vm10 = vmand %vm6186_vm15, %vm6185_vm7  ;;  %vm6196_vm12 = vnez %v5995_v5  ;;  %v6197_v58 = vld [vmem:[#allocation74_spill] sm:$0xff]  ;;  %v874_v24 = vadd.s32 %v873_v13, %v846_v50  ;;  %vm6203_vm11 = vnez %v5983_v61 }
  0xd7   : > { %6183 = vst [vmem:[#allocation49_spill] sm:$0xff] %v6182_v55  ;;  %v6188_v57 = vsel %vm3686_vm10, 4294967295, %v6187_v57  ;;  %vm3695_vm4 = vmor %vm6192_vm1, %vm6191_vm6  ;;  %v6193_v55 = vmov 0  ;;  %vm6198_vm14 = vnez %v6197_v58  ;;  %vm6205_vm6 = vnez %v6204_v10 }
  0xd8   : > { %6189 = vst [vmem:[#allocation63_spill] sm:$0xff] %v6188_v57  ;;  %v6194_v55 = vsel %vm3695_vm4, 4294967295, %v6193_v55  ;;  %vm816_vm0 = vmand %vm6198_vm14, %vm6196_vm12  ;;  %vm6207_vm1 = vnez %v6206_v11  ;;  %v517_v58 = vadd.s32 %v516_v34, %v490_v47  ;;  %v6209_v13 = vperm.slane %v2270_v40, 2  ;;  %v6215_v11 = vld [vmem:[#allocation47_spill] sm:$0xff] }
  0xd9   : > { %6195 = vst [vmem:[#allocation64_spill] sm:$0xff] %v6194_v55  ;;  %vm6208_vm4 = vmand %vm6205_vm6, %vm6207_vm1  ;;  %v529_v55 = vadd.s32 %v528_v54, %v502_v15  ;;  %v6210_v50 = vmov 0  ;;  %vm6212_vm9 = vcmp.eq.f32.partialorder %v3069_v6, %v2057_v26  ;;  %v6213_v57 = vmov 0  ;;  %v6226_v15 = vld [vmem:[#allocation26_spill] sm:$0xff] }
  0xda   : > { %v492_v5 = vsel %vm6208_vm4, 1, %v5850_v22  ;;  %vm3719_vm12 = vcmp.ne.s32.totalorder %v6209_v13, 0  ;;  %vm3728_vm15 = vmand %vm6212_vm9, %vm3498_vm8  ;;  %vm6216_vm1 = vnez %v6215_v11  ;;  %vm6217_vm4 = vcmp.gt.f32.partialorder %v2876_v46, %v1893_v12 }
  0xdb   : > { %v6211_v50 = vsel %vm3719_vm12, 4294967295, %v6210_v50  ;;  %v6214_v57 = vsel %vm3728_vm15, 4294967295, %v6213_v57  ;;  %vm3737_vm14 = vmor %vm6217_vm4, %vm6216_vm1  ;;  %v6218_v34 = vmov 0  ;;  %v848_v54 = vsel %vm816_vm0, 1, %v5850_v22 }
  0xdc   : > { %v6219_v34 = vsel %vm3737_vm14, 4294967295, %v6218_v34  ;;  %vm6220_vm12 = vnez %v5976_v51  ;;  %vm6222_vm10 = vcmp.gt.f32.partialorder %v6221_v39, %v2008_v18  ;;  %v6223_v47 = vmov 0  ;;  %v6232_v51 = vld [vmem:[#allocation52_spill] sm:$0xff] }
  0xdd   : > { %vm3747_vm8 = vmor %vm6222_vm10, %vm6220_vm12  ;;  %vm6227_vm9 = vnez %v6226_v15  ;;  %vm6228_vm15 = vcmp.gt.f32.partialorder %v5971_v8, %v2057_v26  ;;  %v6229_v13 = vmov 0  ;;  %vm6233_vm0 = vnez %v6232_v51  ;;  %v6243_v51 = vld [vmem:[#allocation30_spill] sm:$0xff] }
  0xde   : > { %v6224_v47 = vsel %vm3747_vm8, 4294967295, %v6223_v47  ;;  %vm3756_vm1 = vmor %vm6228_vm15, %vm6227_vm9  ;;  %v6235_v39 = vperm.slane %v1879_v4, 5  ;;  %v6236_v15 = vmov 0  ;;  %vm6238_vm15 = vnez %v5991_v30 }
  0xdf   : > { %6225 = vst [vmem:[#allocation66_spill] sm:$0xff] %v6224_v47  ;;  %v6230_v13 = vsel %vm3756_vm1, 4294967295, %v6229_v13  ;;  %vm6234_vm4 = vmand %vm6203_vm11, %vm6233_vm0  ;;  %vm6239_vm9 = vcmp.gt.f32.partialorder %v2392_v17, %v2008_v18  ;;  %v6240_v8 = vmov 0  ;;  %vm6244_vm0 = vnez %v6243_v51  ;;  %v6245_v47 = vld [vmem:[#allocation22_spill] sm:$0xff] }
  0xe0   : > { %6231 = vst [vmem:[#allocation53_spill] sm:$0xff] %v6230_v13  ;;  %v504_v11 = vsel %vm6234_vm4, 1, %v5850_v22  ;;  %vm3771_vm12 = vcmp.lt.s32.totalorder %v6235_v39, %v1879_v4  ;;  %vm3780_vm1 = vmor %vm6239_vm9, %vm6238_vm15  ;;  %v875_v13 = vadd.s32 %v874_v24, %v848_v54  ;;  %v6247_v39 = vld [vmem:[#allocation43_spill] sm:$0xff]  ;;  %v521_v4 = vadd.s32 %v485_v0, %v483_v28  ;;  %v6262_v24 = vld [vmem:[#allocation28_spill] sm:$0xff] }
  0xe1   : > { %v6237_v15 = vsel %vm3771_vm12, 4294967295, %v6236_v15  ;;  %v6241_v8 = vsel %vm3780_vm1, 4294967295, %v6240_v8  ;;  %vm818_vm4 = vmand %vm6244_vm0, %vm3384_vm2  ;;  %v6249_v30 = vperm.slane %v2225_v42, 7  ;;  %v6250_v17 = vmov 0 }
  0xe2   : > { %6242 = vst [vmem:[#allocation35_spill] sm:$0xff] %v6241_v8  ;;  %v6252_v8 = vperm.slane %v2270_v40, 3  ;;  %vm6255_vm9 = vnez %v6012_v36  ;;  %vm6256_vm14 = vcmp.gt.f32.partialorder %v2961_v35, %v1893_v12  ;;  %v6257_v42 = vmov 0  ;;  %v6264_v36 = vld [vmem:[#allocation57_spill] sm:$0xff] }
  0xe3   : > { %vm3794_vm11 = vcmp.ne.s32.totalorder %v6249_v30, 0  ;;  %vm3811_vm0 = vmor %vm6256_vm14, %vm6255_vm9  ;;  %v850_v28 = vsel %vm818_vm4, 1, %v5850_v22  ;;  %vm6259_vm10 = vnez %v5955_v60  ;;  %vm6260_vm1 = vnez %v5752_v43  ;;  %v6269_v30 = vld [vmem:[#allocation58_spill] sm:$0xff] }
  0xe4   : > { %v6251_v17 = vsel %vm3794_vm11, 4294967295, %v6250_v17  ;;  %vm3800_vm15 = vcmp.ne.s32.totalorder %v6252_v8, 0  ;;  %v6258_v42 = vsel %vm3811_vm0, 4294967295, %v6257_v42  ;;  %vm6263_vm2 = vnez %v6262_v24  ;;  %v6267_v8 = vld [vmem:[#allocation29_spill] sm:$0xff]  ;;  %v6272_v43 = vld [vmem:[#allocation54_spill] sm:$0xff] }
  0xe5   : > { %v6254_v41 = vsel %vm3800_vm15, 4294967295, %v6253_v41  ;;  %vm6261_vm15 = vmand %vm6259_vm10, %vm6260_vm1  ;;  %vm6265_vm8 = vnez %v6264_v36  ;;  %vm6268_vm14 = vnez %v6267_v8  ;;  %vm6270_vm9 = vnez %v6269_v30  ;;  %v6279_v24 = vld [vmem:[#allocation50_spill] sm:$0xff]  ;;  %v6281_v36 = vld [vmem:[#allocation60_spill] sm:$0xff] }
  0xe6   : > { %v487_v0 = vsel %vm6261_vm15, 1, %v5850_v22  ;;  %vm6266_vm7 = vmand %vm6263_vm2, %vm6265_vm8  ;;  %vm6273_vm1 = vnez %v6272_v43  ;;  %vm6274_vm10 = vcmp.gt.f32.partialorder %v2876_v46, %v2057_v26  ;;  %v6275_v60 = vmov 0 }
  0xe7   : > { %v499_v54 = vsel %vm6266_vm7, 1, %v5850_v22  ;;  %vm6271_vm4 = vmand %vm6268_vm14, %vm6270_vm9  ;;  %vm6278_vm7 = vnez %v6089_v1  ;;  %vm6280_vm8 = vnez %v6279_v24  ;;  %vm6285_vm0 = vnez %v6074_v63 }
  0xe8   : > { %v501_v51 = vsel %vm6271_vm4, 1, %v5850_v22  ;;  %vm3841_vm15 = vmor %vm6274_vm10, %vm6273_vm1  ;;  %v518_v46 = vadd.s32 %v517_v58, %v492_v5  ;;  %v530_v30 = vadd.s32 %v529_v55, %v504_v11  ;;  %v6286_v43 = vperm.slane %v2270_v40, 4  ;;  %v6294_v58 = vld [vmem:[#allocation61_spill] sm:$0xff]  ;;  %v6301_v5 = vld [vmem:[#allocation55_spill] sm:$0xff] }
  0xe9   : > { %v6276_v60 = vsel %vm3841_vm15, 4294967295, %v6275_v60  ;;  %vm6290_vm9 = vcmp.eq.f32.partialorder %v2534_v37, %v2008_v18  ;;  %v6291_v8 = vmov 0  ;;  %vm6295_vm5 = vnez %v6294_v58 }
  0xea   : > { %6277 = vst [vmem:[#allocation68_spill] sm:$0xff] %v6276_v60  ;;  %vm3859_vm1 = vcmp.ne.s32.totalorder %v6286_v43, 0  ;;  %v6287_v60 = vmov 0  ;;  %vm3870_vm2 = vmand %vm6290_vm9, %vm3771_vm12  ;;  %vm6296_vm4 = vcmp.gt.f32.partialorder %v3069_v6, %v1893_v12  ;;  %v6297_v55 = vmov 0  ;;  %v6304_v43 = vld [vmem:[#allocation31_spill] sm:$0xff] }
  0xeb   : > { %v6288_v60 = vsel %vm3859_vm1, 4294967295, %v6287_v60  ;;  %v6292_v8 = vsel %vm3870_vm2, 4294967295, %v6291_v8  ;;  %vm3879_vm14 = vmor %vm6296_vm4, %vm6295_vm5  ;;  %v876_v11 = vadd.s32 %v875_v13, %v850_v28  ;;  %vm6303_vm2 = vnez %v6070_v52  ;;  %v6310_v13 = vld [vmem:[#allocation27_spill] sm:$0xff] }
  0xec   : > { %6289 = vst [vmem:[#allocation20_spill] sm:$0xff] %v6288_v60  ;;  %v6298_v55 = vsel %vm3879_vm14, 4294967295, %v6297_v55  ;;  %vm6305_vm15 = vnez %v6304_v43  ;;  %v6307_v60 = vld [vmem:[#allocation32_spill] sm:$0xff]  ;;  %vm6311_vm14 = vnez %v6310_v13  ;;  %vm6312_vm9 = vcmp.gt.f32.partialorder %v2441_v29, %v2008_v18  ;;  %v6316_v43 = vld [vmem:[#allocation33_spill] sm:$0xff] }
  0xed   : > { %6293 = vst [vmem:[#allocation69_spill] sm:$0xff] %v6292_v8  ;;  %vm6306_vm12 = vmand %vm6303_vm2, %vm6305_vm15  ;;  %vm6308_vm5 = vnez %v6307_v60  ;;  %v6313_v28 = vmov 0  ;;  %vm6319_vm15 = vnez %v6318_v20  ;;  %v522_v13 = vadd.s32 %v521_v4, %v487_v0 }
  0xee   : > { %6299 = vst [vmem:[#allocation39_spill] sm:$0xff] %v6298_v55  ;;  %v494_v58 = vsel %vm6306_vm12, 1, %v5850_v22  ;;  %vm6309_vm4 = vmand %vm6285_vm0, %vm6308_vm5  ;;  %v535_v8 = vadd.s32 %v501_v51, %v499_v54  ;;  %v575_v29 = vperm.slane %v2270_v40, 7  ;;  %v6321_v63 = vperm.slane %v2270_v40, 5  ;;  %v6354_v51 = vld [vmem:[#allocation72_spill] sm:$0xff] }
  0xef   : > { %v506_v55 = vsel %vm6309_vm4, 1, %v5850_v22  ;;  %vm3908_vm10 = vmor %vm6312_vm9, %vm6311_vm14  ;;  %vm6324_vm4 = vnez %v6097_v56  ;;  %vm6325_vm1 = vcmp.gt.f32.partialorder %v3169_v45, %v1893_v12  ;;  %v6326_v1 = vmov 0 }
  0xf0   : > { %v6314_v28 = vsel %vm3908_vm10, 4294967295, %v6313_v28  ;;  %vm6320_vm5 = vmand %vm6280_vm8, %vm6278_vm7  ;;  %vm3925_vm14 = vcmp.ne.s32.totalorder %v6321_v63, 0  ;;  %vm6331_vm9 = vnez %v6045_v2  ;;  %vm6332_vm0 = vnez %v5844_v21 }
  0xf1   : > { %6315 = vst [vmem:[#allocation56_spill] sm:$0xff] %v6314_v28  ;;  %v852_v60 = vsel %vm6320_vm5, 1, %v5850_v22  ;;  %v6322_v28 = vmov 0  ;;  %vm3936_vm7 = vmor %vm6325_vm1, %vm6324_vm4  ;;  %vm6328_vm5 = vnez %v6101_v48  ;;  %vm6334_vm1 = vnez %v5876_v38 }
  0xf2   : > { %v6323_v28 = vsel %vm3925_vm14, 4294967295, %v6322_v28  ;;  %v6327_v1 = vsel %vm3936_vm7, 4294967295, %v6326_v1  ;;  %vm6333_vm12 = vmand %vm6331_vm9, %vm6332_vm0  ;;  %vm6335_vm4 = vnez %v5849_v49  ;;  %vm6337_vm8 = vnez %v6119_v19  ;;  %v6350_v19 = vld [vmem:[#allocation38_spill] sm:$0xff] }
  0xf3   : > { %v489_v4 = vsel %vm6333_vm12, 1, %v5850_v22  ;;  %vm6336_vm7 = vmand %vm6334_vm1, %vm6335_vm4  ;;  %vm6338_vm14 = vcmp.gt.f32.partialorder %v2961_v35, %v2057_v26  ;;  %v6339_v21 = vmov 0  ;;  %vm6341_vm12 = vnez %v6124_v9  ;;  %v6351_v9 = vld [vmem:[#allocation71_spill] sm:$0xff] }
  0xf4   : > { %v503_v56 = vsel %vm6336_vm7, 1, %v5850_v22  ;;  %vm3969_vm0 = vmor %vm6338_vm14, %vm6337_vm8  ;;  %vm6342_vm9 = vnez %v6116_v31  ;;  %v519_v35 = vadd.s32 %v518_v46, %v494_v58  ;;  %v531_v49 = vadd.s32 %v530_v30, %v506_v55  ;;  %v6360_v30 = vld [vmem:[#allocation36_spill] sm:$0xff]  ;;  %v6367_v58 = vld [vmem:[#allocation34_spill] sm:$0xff] }
  0xf5   : > { %v6340_v21 = vsel %vm3969_vm0, 4294967295, %v6339_v21  ;;  %vm824_vm7 = vmand %vm6342_vm9, %vm6341_vm12  ;;  %vm6345_vm8 = vnez %v6146_v44  ;;  %vm6346_vm14 = vcmp.gt.f32.partialorder %v3173_v27, %v1893_v12  ;;  %v6347_v38 = vmov 0 }
  0xf6   : > { %vm3990_vm0 = vmor %vm6346_vm14, %vm6345_vm8  ;;  %vm6349_vm12 = vnez %v6150_v33  ;;  %v856_v2 = vsel %vm824_vm7, 1, %v5850_v22  ;;  %v877_v63 = vadd.s32 %v876_v11, %v852_v60  ;;  %vm6352_vm10 = vnez %v6351_v9  ;;  %v6365_v11 = vld [vmem:[#allocation49_spill] sm:$0xff]  ;;  %v6372_v9 = vld [vmem:[#allocation63_spill] sm:$0xff] }
  0xf7   : > { %v6348_v38 = vsel %vm3990_vm0, 4294967295, %v6347_v38  ;;  %vm6353_vm6 = vmand %vm6155_vm13, %vm6352_vm10  ;;  %vm6355_vm8 = vnez %v6354_v51  ;;  %v6357_v54 = vperm.slane %v2270_v40, 6  ;;  %v6358_v46 = vmov 0  ;;  %v6422_v33 = vld [vmem:[#allocation65_spill] sm:$0xff] }
  0xf8   : > { %v496_v44 = vsel %vm6353_vm6, 1, %v5850_v22  ;;  %vm6356_vm14 = vmand %vm6159_vm3, %vm6355_vm8  ;;  %vm6361_vm7 = vnez %v6360_v30  ;;  %vm6362_vm0 = vcmp.gt.f32.partialorder %v2477_v53, %v2008_v18  ;;  %v6363_v55 = vmov 0 }
  0xf9   : > { %v508_v0 = vsel %vm6356_vm14, 1, %v5850_v22  ;;  %vm4013_vm4 = vcmp.ne.s32.totalorder %v6357_v54, 0  ;;  %vm4022_vm10 = vmor %vm6362_vm0, %vm6361_vm7  ;;  %vm6366_vm6 = vnez %v6365_v11  ;;  %vm6368_vm8 = vnez %v6367_v58  ;;  %v6427_v58 = vld [vmem:[#allocation69_spill] sm:$0xff] }
  0xfa   : > { %v6359_v46 = vsel %vm4013_vm4, 4294967295, %v6358_v46  ;;  %v6364_v55 = vsel %vm4022_vm10, 4294967295, %v6363_v55  ;;  %vm826_vm14 = vmand %vm6368_vm8, %vm6366_vm6  ;;  %v536_v60 = vadd.s32 %v535_v8, %v503_v56  ;;  %vm4039_vm3 = vcmp.ne.s32.totalorder %v575_v29, 0  ;;  %v6377_v8 = vld [vmem:[#allocation64_spill] sm:$0xff] }
  0xfb   : > { %vm6369_vm4 = vmand %vm3794_vm11, %vm6328_vm5  ;;  %v6370_v53 = vmov 0  ;;  %vm6373_vm6 = vnez %v6372_v9  ;;  %vm6374_vm10 = vcmp.gt.f32.partialorder %v3225_v25, %v1893_v12  ;;  %v6375_v48 = vmov 0  ;;  %v6383_v12 = vld [vmem:[#allocation18_spill] sm:$0xff]  ;;  %v6436_v9 = vld [vmem:[#allocation23_spill] sm:$0xff] }
  0xfc   : > { %v854_v40 = vsel %vm6369_vm4, 1, %v5850_v22  ;;  %v6371_v53 = vsel %vm4039_vm3, 4294967295, %v6370_v53  ;;  %vm4052_vm5 = vmor %vm6374_vm10, %vm6373_vm6  ;;  %v858_v29 = vsel %vm826_vm14, 1, %v5850_v22  ;;  %vm6379_vm0 = vnez %v5873_v59 }
  0xfd   : > { %v6376_v48 = vsel %vm4052_vm5, 4294967295, %v6375_v48  ;;  %vm6380_vm7 = vnez %v6199_v16  ;;  %vm6382_vm10 = vnez %v5983_v61  ;;  %vm6384_vm6 = vnez %v6383_v12  ;;  %v6392_v16 = vld [vmem:[#allocation66_spill] sm:$0xff]  ;;  %v6394_v61 = vld [vmem:[#allocation53_spill] sm:$0xff] }
  0xfe   : > { %vm6381_vm3 = vmand %vm6379_vm0, %vm6380_vm7  ;;  %v523_v54 = vadd.s32 %v522_v13, %v489_v4  ;;  %vm6386_vm1 = vnez %v6214_v57  ;;  %vm6387_vm14 = vcmp.gt.f32.partialorder %v3069_v6, %v2057_v26  ;;  %v6388_v30 = vmov 0  ;;  %v6397_v13 = vld [vmem:[#allocation35_spill] sm:$0xff]  ;;  %v6444_v12 = vld [vmem:[#allocation37_spill] sm:$0xff] }
  0xff   : > { %v491_v56 = vsel %vm6381_vm3, 1, %v5850_v22  ;;  %vm6385_vm5 = vmand %vm6382_vm10, %vm6384_vm6  ;;  %vm6390_vm0 = vnez %v6219_v34  ;;  %vm6391_vm3 = vnez %v6211_v50  ;;  %v886_v59 = vadd.s32 %v858_v29, %v856_v2  ;;  %v6399_v4 = vld [vmem:[#allocation67_spill] sm:$0xff] }
 0x100   : > { %v505_v51 = vsel %vm6385_vm5, 1, %v5850_v22  ;;  %vm4078_vm11 = vmor %vm6387_vm14, %vm6386_vm1  ;;  %vm6396_vm6 = vnez %v6247_v39  ;;  %v520_v6 = vadd.s32 %v519_v35, %v496_v44  ;;  %v532_v57 = vadd.s32 %v531_v49, %v508_v0  ;;  %v6487_v39 = vld [vmem:[#allocation44_spill] sm:$0xff] }
 0x101   : > { %v6389_v30 = vsel %vm4078_vm11, 4294967295, %v6388_v30  ;;  %vm828_vm7 = vmand %vm6391_vm3, %vm6390_vm0  ;;  %vm6400_vm14 = vnez %v6399_v4  ;;  %v878_v2 = vadd.s32 %v877_v63, %v854_v40  ;;  %vm6401_vm0 = vnez %v6245_v47  ;;  %v6434_v40 = vld [vmem:[#allocation20_spill] sm:$0xff] }
 0x102   : > { %v860_v34 = vsel %vm828_vm7, 1, %v5850_v22  ;;  %vm6402_vm5 = vmand %vm6396_vm6, %vm6401_vm0  ;;  %vm6403_vm10 = vnez %v6237_v15  ;;  %vm6404_vm2 = vcmp.eq.f32.partialorder %v3169_v45, %v2057_v26  ;;  %v6405_v35 = vmov 0 }
 0x103   : > { %v510_v11 = vsel %vm6402_vm5, 1, %v5850_v22  ;;  %vm4112_vm13 = vmand %vm6404_vm2, %vm6403_vm10  ;;  %vm6407_vm7 = vnez %v6258_v42  ;;  %vm6408_vm11 = vnez %v6254_v41  ;;  %vm6409_vm5 = vnez %v6301_v5  ;;  %v6414_v42 = vld [vmem:[#allocation68_spill] sm:$0xff] }
 0x104   : > { %v6406_v35 = vsel %vm4112_vm13, 4294967295, %v6405_v35  ;;  %vm830_vm1 = vmand %vm6408_vm11, %vm6407_vm7  ;;  %vm6410_vm0 = vnez %v6066_v7  ;;  %vm6412_vm2 = vnez %v6316_v43  ;;  %v887_v49 = vadd.s32 %v886_v59, %v860_v34  ;;  %v6424_v43 = vld [vmem:[#allocation19_spill] sm:$0xff] }
 0x105   : > { %vm6411_vm4 = vmand %vm6409_vm5, %vm6410_vm0  ;;  %v537_v63 = vadd.s32 %v536_v60, %v505_v51  ;;  %vm6415_vm13 = vnez %v6414_v42  ;;  %v862_v5 = vsel %vm830_vm1, 1, %v5850_v22  ;;  %vm6419_vm0 = vnez %v6204_v10 }
 0x106   : > { %v841_v47 = vsel %vm6411_vm4, 1, %v5850_v22  ;;  %vm6413_vm10 = vmand %vm6319_vm15, %vm6412_vm2  ;;  %vm6417_vm15 = vnez %v6377_v8  ;;  %vm6420_vm2 = vnez %v6281_v36  ;;  %v524_v0 = vadd.s32 %v523_v54, %v491_v56  ;;  %v6432_v36 = vld [vmem:[#allocation39_spill] sm:$0xff]  ;;  %v6442_v56 = vld [vmem:[#allocation56_spill] sm:$0xff] }
 0x107   : > { %v843_v15 = vsel %vm6413_vm10, 1, %v5850_v22  ;;  %vm6416_vm4 = vmand %vm6342_vm9, %vm6349_vm12  ;;  %vm6423_vm9 = vnez %v6422_v33  ;;  %vm6425_vm12 = vnez %v6424_v43  ;;  %vm6429_vm1 = vcmp.gt.f32.partialorder %v2534_v37, %v2008_v18  ;;  %v6437_v8 = vld [vmem:[#allocation51_spill] sm:$0xff] }
 0x108   : > { %v857_v7 = vsel %vm6416_vm4, 1, %v5850_v22  ;;  %vm6418_vm5 = vmand %vm6368_vm8, %vm6417_vm15  ;;  %vm6428_vm8 = vnez %v6427_v58  ;;  %v6430_v10 = vmov 0  ;;  %v888_v60 = vadd.s32 %v887_v49, %v862_v5  ;;  %v6472_v5 = vld [vmem:[#allocation13_spill] sm:$0xff]  ;;  %v6483_v58 = vld [vmem:[#allocation14_spill] sm:$0xff] }
 0x109   : > { %v859_v20 = vsel %vm6418_vm5, 1, %v5850_v22  ;;  %vm6421_vm10 = vmand %vm6419_vm0, %vm6420_vm2  ;;  %vm6433_vm5 = vnez %v6432_v36  ;;  %vm6435_vm0 = vnez %v6434_v40  ;;  %v6440_v37 = vmov 0 }
 0x10a   : > { %v493_v31 = vsel %vm6421_vm10, 1, %v5850_v22  ;;  %vm6426_vm4 = vmand %vm6423_vm9, %vm6425_vm12  ;;  %vm6438_vm9 = vnez %v6437_v8  ;;  %vm6439_vm12 = vcmp.eq.f32.partialorder %v6436_v9, %v2057_v26  ;;  %v533_v29 = vadd.s32 %v532_v57, %v510_v11 }
 0x10b   : > { %v507_v44 = vsel %vm6426_vm4, 1, %v5850_v22  ;;  %vm4166_vm15 = vmor %vm6429_vm1, %vm6428_vm8  ;;  %vm6443_vm8 = vnez %v6442_v56  ;;  %vm6445_vm1 = vnez %v6444_v12  ;;  %v879_v54 = vadd.s32 %v843_v15, %v841_v47  ;;  %v6461_v47 = vld [vmem:[#allocation42_spill] sm:$0xff] }
 0x10c   : > { %v6431_v10 = vsel %vm4166_vm15, 4294967295, %v6430_v10  ;;  %vm832_vm2 = vmand %vm6435_vm0, %vm6433_vm5  ;;  %v900_v59 = vadd.s32 %v878_v2, %v520_v6  ;;  %vm6446_vm5 = vnez %v6327_v1  ;;  %vm6448_vm10 = vnez %v6397_v13 }
 0x10d   : > { %vm4181_vm4 = vmand %vm6439_vm12, %vm6438_vm9  ;;  %v864_v51 = vsel %vm832_vm2, 1, %v5850_v22  ;;  %vm6447_vm9 = vnez %v6323_v28  ;;  %v893_v11 = vadd.s32 %v859_v20, %v857_v7  ;;  %v905_v49 = vstv %s4037_s29 }
 0x10e   : > { %v6441_v37 = vsel %vm4181_vm4, 4294967295, %v6440_v37  ;;  %vm834_vm12 = vmand %vm6447_vm9, %vm6446_vm5  ;;  %v889_v34 = vadd.s32 %v888_v60, %v864_v51  ;;  %vm6450_vm2 = vnez %v6106_v62  ;;  %vm6451_vm7 = vnez %v6110_v3  ;;  %v4349_v51 = vld [vmem:[%s1855_s9 + $0x18] sm:$0xff] }
 0x10f   : > { %vm6449_vm4 = vmand %vm6400_vm14, %vm6448_vm10  ;;  %v538_v6 = vadd.s32 %v537_v63, %v507_v44  ;;  %vm6453_vm5 = vnez %v6340_v21  ;;  %v866_v4 = vsel %vm834_vm12, 1, %v5850_v22  ;;  %vm6459_vm9 = vnez %v6135_v32 }
 0x110   : > { %v845_v57 = vsel %vm6449_vm4, 1, %v5850_v22  ;;  %vm6452_vm15 = vmand %vm6450_vm2, %vm6451_vm7  ;;  %vm6455_vm7 = vnez %v6070_v52  ;;  %vm6458_vm4 = vnez %v6158_v23  ;;  %v525_v2 = vadd.s32 %v524_v0, %v493_v31 }
 0x111   : > { %v512_v1 = vsel %vm6452_vm15, 1, %v5850_v22  ;;  %vm6454_vm14 = vmand %vm6391_vm3, %vm6415_vm13  ;;  %vm6456_vm15 = vnez %v6130_v14  ;;  %vm6462_vm3 = vnez %v6348_v38  ;;  %vm6463_vm12 = vnez %v6359_v46  ;;  %v6465_v14 = vld [vmem:[#allocation74_spill] sm:$0xff] }
 0x112   : > { %v861_v13 = vsel %vm6454_vm14, 1, %v5850_v22  ;;  %vm6457_vm10 = vmand %vm6455_vm7, %vm6456_vm15  ;;  %v890_v52 = vadd.s32 %v889_v34, %v866_v4  ;;  %vm6464_vm15 = vnez %v6364_v55  ;;  %v880_v23 = vadd.s32 %v879_v54, %v845_v57  ;;  %v6497_v54 = vld [vmem:[#allocation30_spill] sm:$0xff] }
 0x113   : > { %v495_v3 = vsel %vm6457_vm10, 1, %v5850_v22  ;;  %vm6460_vm2 = vmand %vm6458_vm4, %vm6459_vm9  ;;  %vm6466_vm10 = vnez %v6465_v14  ;;  %vm4249_vm9 = vcmp.lt.s32.totalorder %v900_v59, %v905_v49  ;;  %v534_v38 = vadd.s32 %v533_v29, %v512_v1 }
 0x114   : > { %v509_v50 = vsel %vm6460_vm2, 1, %v5850_v22  ;;  %vm836_vm14 = vmand %vm6463_vm12, %vm6462_vm3  ;;  %vm6469_vm4 = vnez %v6376_v48  ;;  %vm6470_vm3 = vnez %v6371_v53  ;;  %v894_v7 = vadd.s32 %v893_v11, %v861_v13 }
 0x115   : > { %v868_v32 = vsel %vm836_vm14, 1, %v5850_v22  ;;  %vm838_vm13 = vmand %vm6470_vm3, %vm6469_vm4  ;;  %v539_v20 = vadd.s32 %v538_v6, %v509_v50  ;;  %v6473_v31 = vperm.slane %v6472_v5, 6  ;;  %vm6476_vm4 = vnez %v6389_v30  ;;  %v6508_v30 = vld [vmem:[#allocation12_spill] sm:$0xff] }
 0x116   : > { %vm6471_vm14 = vmand %vm6445_vm1, %vm6443_vm8  ;;  %v891_v42 = vadd.s32 %v890_v52, %v868_v32  ;;  %v870_v43 = vsel %vm838_vm13, 1, %v5850_v22  ;;  %vm6478_vm1 = vnez %v6350_v19  ;;  %vm6481_vm3 = vnez %v6394_v61 }
 0x117   : > { %v847_v63 = vsel %vm6471_vm14, 1, %v5850_v22  ;;  %vm4268_vm2 = vcmp.lt.s32.totalorder %v6473_v31, %v6472_v5  ;;  %vm6477_vm8 = vmand %vm6408_vm11, %vm6453_vm5  ;;  %vm6479_vm14 = vnez %v6392_v16  ;;  %v4297_v21 = vadd.s32 %v525_v2, %v495_v3  ;;  %v4308_v16 = vld [vmem:[%s1855_s9 + $0x8] sm:$0xff] }
 0x118   : > { %v863_v48 = vsel %vm6477_vm8, 1, %v5850_v22  ;;  %vm6480_vm7 = vmand %vm6478_vm1, %vm6479_vm14  ;;  %v892_v0 = vadd.s32 %v891_v42, %v870_v43  ;;  %vm6484_vm11 = vnez %v6483_v58  ;;  %v6485_v19 = vmov 0 }
 0x119   : > { %v4289_v44 = vsel %vm6480_vm7, 1, %v5850_v22  ;;  %vm6482_vm12 = vmand %vm6396_vm6, %vm6481_vm3  ;;  %vm6488_vm6 = vnez %v6406_v35  ;;  %v881_v36 = vadd.s32 %v880_v23, %v847_v63  ;;  %v915_v60 = vstv %s4192_s14 }
 0x11a   : > { %v511_v41 = vsel %vm6482_vm12, 1, %v5850_v22  ;;  %vm4303_vm5 = vmand %vm6484_vm11, %vm4249_vm9  ;;  %vm6489_vm12 = vcmp.gt.f32.partialorder %v3169_v45, %v2057_v26  ;;  %vm6492_vm8 = vcmp.eq.f32.partialorder %v6461_v47, %v2008_v18  ;;  %v895_v29 = vadd.s32 %v894_v7, %v863_v48  ;;  %v1604_v48 = vld [vmem:[%s1855_s9] sm:$0xff] }
 0x11b   : > { %v6486_v19 = vsel %vm4303_vm5, 4294967295, %v6485_v19  ;;  %vm4317_vm7 = vmor %vm6489_vm12, %vm6488_vm6  ;;  %v4325_v8 = vsel %vm4303_vm5, 1, %v5850_v22  ;;  %v902_v56 = vadd.s32 %v892_v0, %v534_v38  ;;  %v4346_v12 = vadd.s32 %v539_v20, %v511_v41 }
 0x11c   : > { %vm4336_vm1 = vmand %vm6492_vm8, %vm4268_vm2  ;;  %vm6496_vm12 = vnez %v6431_v10  ;;  %vm6498_vm8 = vnez %v6497_v54  ;;  %v947_v59 = vrot.slane %v4325_v8, 2  ;;  %v6502_v57 = vmov 0 }
 0x11d   : > { %vm6495_vm14 = vmand %vm6466_vm10, %vm6464_vm15  ;;  %vm6500_vm10 = vnez %v6441_v37  ;;  %v6504_v34 = vperm.slane %v6472_v5, 7  ;;  %v6509_v37 = vld [vmem:[#allocation15_spill] sm:$0xff]  ;;  %vm5463_vm3 = vcmp.gt.s32.totalorder %v6508_v30, 1  ;;  %vm5462_vm5 = vcmp.gt.s32.totalorder %v6508_v30, 3 }
 0x11e   : > { %v849_v35 = vsel %vm6495_vm14, 1, %v5850_v22  ;;  %vm6499_vm15 = vmand %vm6435_vm0, %vm6476_vm4  ;;  %vm6501_vm14 = vcmp.gt.f32.partialorder %v6436_v9, %v2057_v26  ;;  %vm6507_vm0 = vnez %v6323_v28  ;;  %v946_v1 = vrot.slane %v4325_v8, 1 }
 0x11f   : > { %v865_v55 = vsel %vm6499_vm15, 1, %v5850_v22  ;;  %vm4371_vm11 = vmor %vm6501_vm14, %vm6500_vm10  ;;  %vm4378_vm6 = vcmp.lt.s32.totalorder %v6504_v34, %v6472_v5  ;;  %vm918_vm15 = vcmp.lt.s32.totalorder %v902_v56, %v915_v60  ;;  %v882_v9 = vadd.s32 %v881_v36, %v849_v35 }
 0x120   : > { %v6503_v57 = vsel %vm4371_vm11, 4294967295, %v6502_v57  ;;  %vm835_vm4 = vmand %vm6507_vm0, %vm4317_vm7  ;;  %vm6510_vm14 = vnez %v6509_v37  ;;  %vm6513_vm10 = vcmp.eq.f32.partialorder %v3173_v27, %v2057_v26  ;;  %v896_v4 = vadd.s32 %v895_v29, %v865_v55 }
 0x121   : > { %vm4392_vm9 = vmand %vm6510_vm14, %vm918_vm15  ;;  %v948_v50 = vrot.slane %v4325_v8, 3  ;;  %v960_v14 = vperm.slane %v4325_v8, 0  ;;  %v962_v32 = vperm.slane %v947_v59, 0  ;;  %v950_v28 = vrot.slane %v4325_v8, 5 }
 0x122   : > { %vm4405_vm13 = vmand %vm6513_vm10, %vm4268_vm2  ;;  %v937_v3 = vsel %vm4392_vm9, 1, %v5850_v22  ;;  %vm6517_vm2 = vcmp.gt.f32.partialorder %v6461_v47, %v2008_v18  ;;  %v867_v18 = vsel %vm835_vm4, 1, %v5850_v22  ;;  %v949_v47 = vrot.slane %v4325_v8, 4 }
 0x123   : > { %vm6516_vm15 = vmand %vm6498_vm8, %vm6496_vm12  ;;  %v953_v52 = vrot.slane %v937_v3, 1  ;;  %v954_v10 = vrot.slane %v937_v3, 2  ;;  %vm6520_vm12 = vcmp.eq.f32.partialorder %v6487_v39, %v4308_v16  ;;  %v955_v15 = vrot.slane %v937_v3, 3 }
 0x124   : > { %v851_v13 = vsel %vm6516_vm15, 1, %v5850_v22  ;;  %vm4424_vm10 = vmor %vm6517_vm2, %vm4336_vm1  ;;  %v968_v38 = vperm.slane %v937_v3, 0  ;;  %vm6523_vm1 = vcmp.gt.f32.partialorder %v3173_v27, %v2057_v26  ;;  %v951_v42 = vrot.slane %v4325_v8, 6 }
 0x125   : > { %vm4434_vm8 = vmand %vm6520_vm12, %vm4378_vm6  ;;  %v961_v7 = vperm.slane %v946_v1, 0  ;;  %v970_v20 = vperm.slane %v954_v10, 0  ;;  %vm6526_vm7 = vnez %v6279_v24  ;;  %v956_v31 = vrot.slane %v937_v3, 4 }
 0x126   : > { %vm4450_vm14 = vmor %vm6523_vm1, %vm4405_vm13  ;;  %v957_v33 = vrot.slane %v937_v3, 5  ;;  %v963_v26 = vperm.slane %v948_v50, 0  ;;  %v964_v27 = vperm.slane %v949_v47, 0  ;;  %vm6527_vm13 = vcmp.eq.f32.partialorder %v3225_v25, %v4349_v51 }
 0x127   : > { %vm821_vm0 = vmand %vm6526_vm7, %vm4424_vm10  ;;  %v958_v43 = vrot.slane %v937_v3, 6  ;;  %v969_v41 = vperm.slane %v953_v52, 0  ;;  %vm6530_vm2 = vcmp.gt.s32.totalorder %v6508_v30, 0  ;;  %vm6531_vm12 = vcmp.gt.s32.totalorder %v6508_v30, 2 }
 0x128   : > { %vm4466_vm4 = vmand %vm6527_vm13, %vm4378_vm6  ;;  %v976_v0 = vsel %vm6530_vm2, %v960_v14, 0  ;;  %v978_v58 = vsel %vm6531_vm12, %v962_v32, 0  ;;  %vm6532_vm1 = vnez %v6359_v46  ;;  %v971_v61 = vperm.slane %v955_v15, 0 }
 0x129   : > { %vm837_vm15 = vmand %vm6532_vm1, %vm4450_vm14  ;;  %v972_v36 = vperm.slane %v956_v31, 0  ;;  %v853_v56 = vsel %vm821_vm0, 1, %v5850_v22  ;;  %v883_v54 = vadd.s32 %v882_v9, %v851_v13  ;;  %v965_v55 = vperm.slane %v950_v28, 0 }
 0x12a   : > { %vm6533_vm6 = vmmov %vm6530_vm2  ;;  %vm6535_vm2 = vcmp.gt.f32.partialorder %v6487_v39, %v4308_v16  ;;  %v966_v59 = vperm.slane %v951_v42, 0  ;;  %v977_v34 = vsel %vm5463_vm3, %v961_v7, 0  ;;  %v979_v24 = vsel %vm5462_vm5, %v963_v26, 0 }
 0x12b   : > { %v984_v45 = vsel %vm6533_vm6, %v968_v38, 0  ;;  %vm6534_vm13 = vmmov %vm6531_vm12  ;;  %vm6538_vm12 = vcmp.gt.f32.partialorder %v3225_v25, %v4349_v51  ;;  %vm6541_vm10 = vcmp.gt.s32.totalorder %v6508_v30, 4  ;;  %v992_v9 = vadd.s32 %v978_v58, %v976_v0 }
 0x12c   : > { %v986_v35 = vsel %vm6534_vm13, %v970_v20, 0  ;;  %vm4487_vm11 = vmor %vm6535_vm2, %vm4434_vm8  ;;  %v980_v40 = vsel %vm6541_vm10, %v964_v27, 0  ;;  %vm6542_vm8 = vnez %v6503_v57  ;;  %vm6543_vm7 = vnez %v6106_v62 }
 0x12d   : > { %vm4502_vm6 = vmor %vm6538_vm12, %vm4466_vm4  ;;  %v869_v25 = vsel %vm837_vm15, 1, %v5850_v22  ;;  %v897_v37 = vadd.s32 %v896_v4, %v867_v18  ;;  %v973_v1 = vperm.slane %v957_v33, 0  ;;  %v999_v6 = vadd.s32 %v986_v35, %v984_v45 }
 0x12e   : > { %vm481_vm0 = vmand %vm6543_vm7, %vm6542_vm8  ;;  %vm6544_vm4 = vnez %v6251_v17  ;;  %v974_v13 = vperm.slane %v958_v43, 0  ;;  %v985_v50 = vsel %vm5463_vm3, %v969_v41, 0  ;;  %v987_v2 = vsel %vm5462_vm5, %v971_v61, 0  ;;  %v1605_v61 = vld [vmem:[%s1855_s9 + $0x10] sm:$0xff] }
 0x12f   : > { %vm823_vm13 = vmand %vm6544_vm4, %vm4487_vm11  ;;  %vm6546_vm14 = vnez %v6371_v53  ;;  %vm5461_vm1 = vcmp.gt.s32.totalorder %v6508_v30, 6  ;;  %v993_v4 = vadd.s32 %v979_v24, %v977_v34  ;;  %v994_v17 = vadd.s32 %v992_v9, %v980_v40 }
 0x130   : > { %vm6545_vm2 = vmmov %vm6541_vm10  ;;  %v1007_v52 = vadd.s32 %v949_v47, %v4325_v8  ;;  %v884_v10 = vadd.s32 %v883_v54, %v853_v56  ;;  %vm6547_vm11 = vcmp.gt.s32.totalorder %v6508_v30, 5  ;;  %v982_v32 = vsel %vm5461_vm1, %v966_v59, 0 }
 0x131   : > { %v988_v46 = vsel %vm6545_vm2, %v972_v36, 0  ;;  %vm839_vm15 = vmand %vm6546_vm14, %vm4502_vm6  ;;  %v981_v14 = vsel %vm6547_vm11, %v965_v55, 0  ;;  %v1013_v23 = vadd.s32 %v956_v31, %v937_v3  ;;  %v855_v18 = vsel %vm823_vm13, 1, %v5850_v22 }
 0x132   : > { %v898_v15 = vadd.s32 %v897_v37, %v869_v25  ;;  %v1000_v38 = vadd.s32 %v987_v2, %v985_v50  ;;  %v1001_v53 = vadd.s32 %v999_v6, %v988_v46  ;;  %v513_v8 = vsel %vm481_vm0, 1, %v5850_v22  ;;  %vm6548_vm12 = vmmov %vm6547_vm11 }
 0x133   : > { %v871_v47 = vsel %vm839_vm15, 1, %v5850_v22  ;;  %v989_v63 = vsel %vm6548_vm12, %v973_v1, 0  ;;  %v990_v3 = vsel %vm5461_vm1, %v974_v13, 0  ;;  %v995_v28 = vadd.s32 %v993_v4, %v981_v14 }
 0x134   : > { %v996_v42 = vadd.s32 %v994_v17, %v982_v32  ;;  %v1008_v7 = vrot.slane %v1007_v52, 2  ;;  %v527_v20 = vadd.s32 %v4297_v21, %v4289_v44  ;;  %v885_v62 = vadd.s32 %v884_v10, %v855_v18 }
 0x135   : > { %v1014_v31 = vrot.slane %v1013_v23, 2  ;;  %v541_v57 = vadd.s32 %v4346_v12, %v513_v8  ;;  %v899_v33 = vadd.s32 %v898_v15, %v871_v47  ;;  %v1002_v26 = vadd.s32 %v1000_v38, %v989_v63 }
 0x136   : > { %v1003_v27 = vadd.s32 %v1001_v53, %v990_v3  ;;  %vm6549_vm6 = vnez %v6486_v19  ;;  %v998_v41 = vadd.s32 %v996_v42, %v995_v28  ;;  %v1009_v0 = vadd.s32 %v1008_v7, %v1007_v52 }
 0x137   : > { %v4560_v43 = vsel %vm6549_vm6, %v1604_v48, 0.0  ;;  %v901_v58 = vadd.s32 %v885_v62, %v527_v20  ;;  %v4565_v36 = vsel %vm4392_vm9, %v1605_v61, 0.0  ;;  %v4567_v44 = vadd.s32 %v1014_v31, %v1013_v23 }
 0x138   : > { %v4569_v21 = vadd.s32 %v899_v33, %v541_v57  ;;  %v1005_v12 = vadd.s32 %v1003_v27, %v1002_v26  ;;  %v1084_v45 = vrot.slane %v4560_v43, 1  ;;  %v1085_v35 = vrot.slane %v4560_v43, 2 }
 0x139   : > { %v1086_v29 = vrot.slane %v4560_v43, 3  ;;  %v1087_v56 = vrot.slane %v4560_v43, 4  ;;  %v1088_v54 = vrot.slane %v4560_v43, 5  ;;  %v1089_v55 = vrot.slane %v4560_v43, 6 }
 0x13a   : > { %v1010_v59 = vrot.slane %v1009_v0, 1  ;;  %v1018_v39 = vsel %vm6549_vm6, %v998_v41, 16  ;;  %v1090_v34 = vrot.slane %v4560_v43, 7  ;;  %v1091_v24 = vrot.slane %v4565_v36, 1 }
 0x13b   : > { %v1016_v40 = vrot.slane %v4567_v44, 1  ;;  %v1092_v9 = vrot.slane %v4565_v36, 2  ;;  %v1093_v25 = vrot.slane %v4565_v36, 3  ;;  %v1094_v37 = vrot.slane %v4565_v36, 4 }
 0x13c   : > { %v1019_v1 = vsel %vm4392_vm9, %v1005_v12, 16  ;;  %v1095_v6 = vrot.slane %v4565_v36, 5  ;;  %v1096_v19 = vrot.slane %v4565_v36, 6  ;;  %v1097_v13 = vrot.slane %v4565_v36, 7  ;;  %v6573_v12 = vld [vmem:[#allocation17_spill] sm:$0xff] }
 0x13d   : > { %v1020_v50 = vrot.slane %v1018_v39, 1  ;;  %v1021_v2 = vrot.slane %v1018_v39, 2  ;;  %v1022_v46 = vrot.slane %v1018_v39, 3  ;;  %v1023_v4 = vrot.slane %v1018_v39, 4 }
 0x13e   : > { %v4590_v17 = vadd.s32 %v1010_v59, %v1009_v0  ;;  %v1024_v52 = vrot.slane %v1018_v39, 5  ;;  %v1025_v10 = vrot.slane %v1018_v39, 6  ;;  %v1026_v14 = vrot.slane %v1018_v39, 7 }
 0x13f   : > { %v1027_v32 = vrot.slane %v1019_v1, 1  ;;  %v1028_v23 = vrot.slane %v1019_v1, 2  ;;  %v1029_v18 = vrot.slane %v1019_v1, 3  ;;  %v1030_v11 = vrot.slane %v1019_v1, 4 }
 0x140   : > { %v1031_v15 = vrot.slane %v1019_v1, 5  ;;  %v1032_v38 = vrot.slane %v1019_v1, 6  ;;  %v1033_v53 = vrot.slane %v1019_v1, 7  ;;  %v1034_v8 = vperm.slane %v1018_v39, 0 }
 0x141   : > { %v1035_v47 = vperm.slane %v1020_v50, 0  ;;  %v4592_v63 = vperm.slane %v1021_v2, 0  ;;  %v4594_v3 = vperm.slane %v1022_v46, 0  ;;  %v4596_v28 = vperm.slane %v1023_v4, 0 }
 0x142   : > { %v4598_v42 = vperm.slane %v1024_v52, 0  ;;  %v4600_v7 = vperm.slane %v1025_v10, 0  ;;  %v4602_v20 = vperm.slane %v1026_v14, 0  ;;  %v1042_v62 = vperm.slane %v1019_v1, 0 }
 0x143   : > { %v1043_v31 = vperm.slane %v1027_v32, 0  ;;  %v4604_v57 = vperm.slane %v1028_v23, 0  ;;  %v4606_v33 = vperm.slane %v1029_v18, 0  ;;  %v4608_v26 = vperm.slane %v1030_v11, 0 }
 0x144   : > { %v4610_v27 = vperm.slane %v1031_v15, 0  ;;  %v4612_v48 = vperm.slane %v1032_v38, 0  ;;  %v4614_v41 = vperm.slane %v1033_v53, 0  ;;  %vm4617_vm9 = vcmp.eq.s32.totalorder %v1034_v8, %v6508_v30 }
 0x145   : > { %vm4622_vm10 = vcmp.eq.s32.totalorder %v1034_v8, %v6472_v5  ;;  %vm1052_vm8 = vcmp.eq.s32.totalorder %v1035_v47, %v6508_v30  ;;  %vm1053_vm7 = vcmp.eq.s32.totalorder %v1035_v47, %v6472_v5  ;;  %vm1054_vm0 = vcmp.eq.s32.totalorder %v4592_v63, %v6508_v30 }
 0x146   : > { %vm4632_vm4 = vcmp.lt.s32.totalorder %v901_v58, %v905_v49  ;;  %vm4647_vm12 = vcmp.eq.s32.totalorder %v1042_v62, %v6508_v30  ;;  %vm4652_vm6 = vcmp.eq.s32.totalorder %v1042_v62, %v6472_v5  ;;  %vm1068_vm1 = vcmp.eq.s32.totalorder %v1043_v31, %v6508_v30 }
 0x147   : > { %vm1069_vm5 = vcmp.eq.s32.totalorder %v1043_v31, %v6472_v5  ;;  %vm4661_vm3 = vcmp.lt.s32.totalorder %v4569_v21, %v915_v60  ;;  %v1098_v60 = vperm.slane %v4560_v43, 0  ;;  %v1099_v21 = vperm.slane %v1084_v45, 0 }
 0x148   : > { %vm1072_vm15 = vcmp.eq.s32.totalorder %v4606_v33, %v6508_v30  ;;  %v1106_v39 = vperm.slane %v4565_v36, 0  ;;  %v1107_v1 = vperm.slane %v1091_v24, 0  ;;  %vm1074_vm13 = vcmp.eq.s32.totalorder %v4608_v26, %v6508_v30  ;;  %v6564_v36 = vld [vmem:[#allocation16_spill] sm:$0xff] }
 0x149   : > { %vm1075_vm2 = vcmp.eq.s32.totalorder %v4608_v26, %v6472_v5  ;;  %vm1076_vm11 = vcmp.eq.s32.totalorder %v4610_v27, %v6508_v30  ;;  %v1100_v45 = vperm.slane %v1085_v35, 0  ;;  %v1101_v50 = vperm.slane %v1086_v29, 0 }
 0x14a   : > { %v1102_v2 = vperm.slane %v1087_v56, 0  ;;  %vm1077_vm14 = vcmp.eq.s32.totalorder %v4610_v27, %v6472_v5  ;;  %v1103_v24 = vperm.slane %v1088_v54, 0  ;;  %v1104_v46 = vperm.slane %v1089_v55, 0 }
 0x14b   : > { %v4707_v4 = vperm.slane %v1090_v34, 0  ;;  %v1108_v35 = vperm.slane %v1092_v9, 0  ;;  %v1130_v29 = vsel %vm4617_vm9, %v1098_v60, 0.0  ;;  %v1131_v56 = vsel %vm4622_vm10, %v1098_v60, 0.0 }
 0x14c   : > { %v1132_v52 = vsel %vm1052_vm8, %v1099_v21, 0.0  ;;  %v1133_v54 = vsel %vm1053_vm7, %v1099_v21, 0.0  ;;  %v1146_v43 = vsel %vm4647_vm12, %v1106_v39, 0.0  ;;  %v1147_v55 = vsel %vm4652_vm6, %v1106_v39, 0.0 }
 0x14d   : > { %v1148_v34 = vsel %vm1068_vm1, %v1107_v1, 0.0  ;;  %v1149_v9 = vsel %vm1069_vm5, %v1107_v1, 0.0  ;;  %v1109_v10 = vperm.slane %v1093_v25, 0  ;;  %v1110_v14 = vperm.slane %v1094_v37, 0 }
 0x14e   : > { %v1111_v32 = vperm.slane %v1095_v6, 0  ;;  %v4735_v23 = vperm.slane %v1096_v19, 0  ;;  %v4739_v18 = vperm.slane %v1097_v13, 0  ;;  %v1134_v11 = vsel %vm1054_vm0, %v1100_v45, 0.0 }
 0x14f   : > { %vm6562_vm5 = vcmp.eq.s32.totalorder %v4592_v63, %v6472_v5  ;;  %vm6563_vm1 = vcmp.eq.s32.totalorder %v4604_v57, %v6508_v30  ;;  %v1162_v6 = vadd.f32 %v1132_v52, %v1130_v29  ;;  %v1169_v15 = vadd.f32 %v1133_v54, %v1131_v56 }
 0x150   : > { %v1135_v25 = vsel %vm6562_vm5, %v1100_v45, 0.0  ;;  %v1150_v37 = vsel %vm6563_vm1, %v1108_v35, 0.0  ;;  %v1176_v19 = vadd.f32 %v1148_v34, %v1146_v43  ;;  %v1183_v38 = vadd.f32 %v1149_v9, %v1147_v55 }
 0x151   : > { %vm6565_vm9 = vnez %v6564_v36  ;;  %vm6568_vm8 = vcmp.eq.s32.totalorder %v4594_v3, %v6508_v30  ;;  %vm6569_vm7 = vcmp.eq.s32.totalorder %v4594_v3, %v6472_v5  ;;  %vm6570_vm0 = vcmp.eq.s32.totalorder %v4596_v28, %v6508_v30 }
 0x152   : > { %vm4754_vm10 = vmand %vm6565_vm9, %vm4632_vm4  ;;  %v1136_v53 = vsel %vm6568_vm8, %v1101_v50, 0.0  ;;  %v1137_v8 = vsel %vm6569_vm7, %v1101_v50, 0.0  ;;  %v1138_v47 = vsel %vm6570_vm0, %v1102_v2, 0.0  ;;  %vm6571_vm12 = vcmp.eq.s32.totalorder %v4604_v57, %v6472_v5 }
 0x153   : > { %v1151_v63 = vsel %vm6571_vm12, %v1108_v35, 0.0  ;;  %vm6572_vm4 = vcmp.eq.s32.totalorder %v4596_v28, %v6472_v5  ;;  %v1163_v31 = vadd.f32 %v1162_v6, %v1134_v11  ;;  %v1170_v0 = vadd.f32 %v1169_v15, %v1135_v25 }
 0x154   : > { %v1139_v62 = vsel %vm6572_vm4, %v1102_v2, 0.0  ;;  %v1177_v61 = vadd.f32 %v1176_v19, %v1150_v37  ;;  %vm6574_vm6 = vnez %v6573_v12  ;;  %vm6577_vm1 = vcmp.eq.s32.totalorder %v4598_v42, %v6508_v30 }
 0x155   : > { %vm4777_vm5 = vmand %vm6574_vm6, %vm4661_vm3  ;;  %v1140_v57 = vsel %vm6577_vm1, %v1103_v24, 0.0  ;;  %vm6578_vm9 = vcmp.eq.s32.totalorder %v4598_v42, %v6472_v5  ;;  %vm6579_vm8 = vcmp.eq.s32.totalorder %v4600_v7, %v6508_v30  ;;  %v1152_v58 = vsel %vm1072_vm15, %v1109_v10, 0.0 }
 0x156   : > { %v1141_v28 = vsel %vm6578_vm9, %v1103_v24, 0.0  ;;  %v4790_v49 = vsel %vm6579_vm8, %v1104_v46, 0.0  ;;  %vm6580_vm3 = vcmp.eq.s32.totalorder %v4600_v7, %v6472_v5  ;;  %vm6581_vm7 = vcmp.eq.s32.totalorder %v4606_v33, %v6472_v5 }
 0x157   : > { %v4798_v59 = vsel %vm6580_vm3, %v1104_v46, 0.0  ;;  %v1153_v60 = vsel %vm6581_vm7, %v1109_v10, 0.0  ;;  %v1184_v42 = vadd.f32 %v1183_v38, %v1151_v63  ;;  %v1194_v21 = vsel %vm4754_vm10, 1, %v5850_v22 }
 0x158   : > { %v1154_v39 = vsel %vm1074_vm13, %v1110_v14, 0.0  ;;  %v1155_v1 = vsel %vm1075_vm2, %v1110_v14, 0.0  ;;  %v1156_v7 = vsel %vm1076_vm11, %v1111_v32, 0.0  ;;  %v1164_v45 = vadd.f32 %v1163_v31, %v1136_v53 }
 0x159   : > { %v4818_v33 = vsel %vm1077_vm14, %v1111_v32, 0.0  ;;  %v1171_v50 = vadd.f32 %v1170_v0, %v1137_v8  ;;  %v1178_v2 = vadd.f32 %v1177_v61, %v1152_v58  ;;  %v1195_v24 = vsel %vm4777_vm5, 1, %v5850_v22 }
 0x15a   : > { %v1196_v46 = vrot.slane %v1194_v21, 1  ;;  %v1197_v35 = vrot.slane %v1194_v21, 2  ;;  %v1198_v26 = vrot.slane %v1194_v21, 3  ;;  %v1199_v29 = vrot.slane %v1194_v21, 4 }
 0x15b   : > { %v1185_v56 = vadd.f32 %v1184_v42, %v1153_v60  ;;  %v1200_v52 = vrot.slane %v1194_v21, 5  ;;  %v1201_v54 = vrot.slane %v1194_v21, 6  ;;  %v1203_v43 = vrot.slane %v1195_v24, 1 }
 0x15c   : > { %vm1078_vm13 = vcmp.eq.s32.totalorder %v4612_v48, %v6508_v30  ;;  %v1165_v27 = vadd.f32 %v1164_v45, %v1138_v47  ;;  %v1204_v55 = vrot.slane %v1195_v24, 2  ;;  %v1205_v34 = vrot.slane %v1195_v24, 3 }
 0x15d   : > { %v1206_v9 = vrot.slane %v1195_v24, 4  ;;  %v1172_v10 = vadd.f32 %v1171_v50, %v1139_v62  ;;  %v1179_v14 = vadd.f32 %v1178_v2, %v1154_v39  ;;  %v1207_v32 = vrot.slane %v1195_v24, 5 }
 0x15e   : > { %v1208_v11 = vrot.slane %v1195_v24, 6  ;;  %vm1064_vm2 = vcmp.eq.s32.totalorder %v4602_v20, %v6508_v30  ;;  %v1210_v22 = vperm.slane %v1194_v21, 0  ;;  %v1211_v25 = vperm.slane %v1196_v46, 0 }
 0x15f   : > { %v1212_v37 = vperm.slane %v1197_v35, 0  ;;  %v1213_v6 = vperm.slane %v1198_v26, 0  ;;  %v1186_v15 = vadd.f32 %v1185_v56, %v1155_v1  ;;  %v1214_v19 = vperm.slane %v1199_v29, 0 }
 0x160   : > { %v1215_v38 = vperm.slane %v1200_v52, 0  ;;  %v1218_v36 = vperm.slane %v1195_v24, 0  ;;  %v1219_v53 = vperm.slane %v1203_v43, 0  ;;  %v1220_v8 = vperm.slane %v1204_v55, 0 }
 0x161   : > { %v1221_v47 = vperm.slane %v1205_v34, 0  ;;  %v1222_v63 = vperm.slane %v1206_v9, 0  ;;  %v1166_v31 = vadd.f32 %v1165_v27, %v1140_v57  ;;  %v1216_v62 = vperm.slane %v1201_v54, 0 }
 0x162   : > { %v1223_v0 = vperm.slane %v1207_v32, 0  ;;  %v1224_v61 = vperm.slane %v1208_v11, 0  ;;  %vm6582_vm14 = vcmp.gt.s32.totalorder %v6508_v30, 0  ;;  %vm6583_vm15 = vcmp.gt.s32.totalorder %v6508_v30, 1 }
 0x163   : > { %v1226_v12 = vsel %vm6582_vm14, %v1210_v22, 0  ;;  %v1227_v58 = vsel %vm6583_vm15, %v1211_v25, 0  ;;  %vm6584_vm11 = vcmp.gt.s32.totalorder %v6508_v30, 2  ;;  %vm6585_vm0 = vcmp.gt.s32.totalorder %v6508_v30, 3  ;;  %vm6586_vm12 = vmmov %vm6582_vm14 }
 0x164   : > { %v1228_v60 = vsel %vm6584_vm11, %v1212_v37, 0  ;;  %v1229_v42 = vsel %vm6585_vm0, %v1213_v6, 0  ;;  %v1173_v21 = vadd.f32 %v1172_v10, %v1141_v28  ;;  %v1234_v39 = vsel %vm6586_vm12, %v1218_v36, 0  ;;  %vm6587_vm4 = vmmov %vm6583_vm15 }
 0x165   : > { %v1235_v57 = vsel %vm6587_vm4, %v1219_v53, 0  ;;  %vm6588_vm6 = vmmov %vm6584_vm11  ;;  %vm6589_vm1 = vcmp.gt.s32.totalorder %v6508_v30, 4  ;;  %vm6590_vm9 = vcmp.gt.s32.totalorder %v6508_v30, 5  ;;  %v1242_v24 = vadd.s32 %v1228_v60, %v1226_v12 }
 0x166   : > { %v1236_v1 = vsel %vm6588_vm6, %v1220_v8, 0  ;;  %v1230_v45 = vsel %vm6589_vm1, %v1214_v19, 0  ;;  %v1231_v50 = vsel %vm6590_vm9, %v1215_v38, 0  ;;  %vm6591_vm8 = vmmov %vm6585_vm0  ;;  %v1243_v46 = vadd.s32 %v1229_v42, %v1227_v58 }
 0x167   : > { %v1237_v2 = vsel %vm6591_vm8, %v1221_v47, 0  ;;  %vm6592_vm3 = vmmov %vm6589_vm1  ;;  %v1249_v35 = vadd.s32 %v1236_v1, %v1234_v39  ;;  %v1180_v29 = vadd.f32 %v1179_v14, %v1156_v7  ;;  %vm6593_vm7 = vcmp.gt.s32.totalorder %v6508_v30, 6 }
 0x168   : > { %v1238_v28 = vsel %vm6592_vm3, %v1222_v63, 0  ;;  %v1250_v26 = vadd.s32 %v1237_v2, %v1235_v57  ;;  %v1232_v56 = vsel %vm6593_vm7, %v1216_v62, 0  ;;  %vm6594_vm14 = vmmov %vm6590_vm9  ;;  %v1158_v43 = vsel %vm1078_vm13, %v4735_v23, 0.0 }
 0x169   : > { %v1239_v52 = vsel %vm6594_vm14, %v1223_v0, 0  ;;  %vm6595_vm15 = vmmov %vm6593_vm7  ;;  %v1244_v27 = vadd.s32 %v1242_v24, %v1230_v45  ;;  %v1245_v55 = vadd.s32 %v1243_v46, %v1231_v50  ;;  %v1251_v34 = vadd.s32 %v1249_v35, %v1238_v28 }
 0x16a   : > { %v1240_v54 = vsel %vm6595_vm15, %v1224_v61, 0  ;;  %vm1065_vm11 = vcmp.eq.s32.totalorder %v4602_v20, %v6472_v5  ;;  %vm1079_vm0 = vcmp.eq.s32.totalorder %v4612_v48, %v6472_v5  ;;  %vm1080_vm12 = vcmp.eq.s32.totalorder %v4614_v41, %v6508_v30 }
 0x16b   : > { %vm1081_vm4 = vcmp.eq.s32.totalorder %v4614_v41, %v6472_v5  ;;  %v1144_v7 = vsel %vm1064_vm2, %v4707_v4, 0.0  ;;  %v1246_v9 = vadd.s32 %v1244_v27, %v1232_v56  ;;  %v1252_v10 = vadd.s32 %v1250_v26, %v1239_v52 }
 0x16c   : > { %v1253_v14 = vadd.s32 %v1251_v34, %v1240_v54  ;;  %v1167_v32 = vadd.f32 %v1166_v31, %v4790_v49  ;;  %v1174_v11 = vadd.f32 %v1173_v21, %v4798_v59  ;;  %v1181_v22 = vadd.f32 %v1180_v29, %v1158_v43 }
 0x16d   : > { %v1187_v48 = vadd.f32 %v1186_v15, %v4818_v33  ;;  %v1145_v25 = vsel %vm1065_vm11, %v4707_v4, 0.0  ;;  %v1159_v37 = vsel %vm1079_vm0, %v4735_v23, 0.0  ;;  %v1160_v6 = vsel %vm1080_vm12, %v4739_v18, 0.0 }
 0x16e   : > { %v1248_v19 = vadd.s32 %v1246_v9, %v1245_v55  ;;  %v4880_v20 = vsel %vm4754_vm10, %v4308_v16, 0.0  ;;  %v4885_v49 = vsel %vm4777_vm5, %v4349_v51, 0.0  ;;  %v1017_v59 = vadd.s32 %v1016_v40, %v4567_v44 }
 0x16f   : > { %v4894_v4 = vsel %vm1081_vm4, %v4739_v18, 0.0  ;;  %v1255_v23 = vadd.s32 %v1253_v14, %v1252_v10  ;;  %v4896_v33 = vadd.f32 %v1167_v32, %v1144_v7  ;;  %v4898_v16 = vadd.f32 %v1174_v11, %v1145_v25 }
 0x170   : > { %v4900_v15 = vadd.f32 %v1181_v22, %v1160_v6  ;;  %v4902_v38 = vadd.f32 %v1187_v48, %v1159_v37  ;;  %v1256_v51 = vadd.s32 %v1248_v19, %v4590_v17  ;;  %v1324_v36 = vrot.slane %v4880_v20, 1 }
 0x171   : > { %v1325_v44 = vrot.slane %v4880_v20, 2  ;;  %v1326_v40 = vrot.slane %v4880_v20, 3  ;;  %v1327_v41 = vrot.slane %v4880_v20, 4  ;;  %v1328_v18 = vrot.slane %v4880_v20, 5 }
 0x172   : > { %v1329_v53 = vrot.slane %v4880_v20, 6  ;;  %v1330_v8 = vrot.slane %v4880_v20, 7  ;;  %v1257_v47 = vadd.s32 %v1255_v23, %v1017_v59  ;;  %v1331_v63 = vrot.slane %v4885_v49, 1 }
 0x173   : > { %v1332_v31 = vrot.slane %v4885_v49, 2  ;;  %v1333_v17 = vrot.slane %v4885_v49, 3  ;;  %v1334_v62 = vrot.slane %v4885_v49, 4  ;;  %v1335_v0 = vrot.slane %v4885_v49, 5 }
 0x174   : > { %v1336_v61 = vrot.slane %v4885_v49, 6  ;;  %v1337_v12 = vrot.slane %v4885_v49, 7  ;;  %v1258_v58 = vsel %vm4754_vm10, %v1256_v51, 16  ;;  %v1338_v60 = vperm.slane %v4880_v20, 0 }
 0x175   : > { %v4922_v42 = vperm.slane %v1324_v36, 0  ;;  %v4924_v21 = vperm.slane %v1325_v44, 0  ;;  %v4926_v39 = vperm.slane %v1326_v40, 0  ;;  %v4928_v57 = vperm.slane %v1327_v41, 0 }
 0x176   : > { %v4930_v1 = vperm.slane %v1328_v18, 0  ;;  %v4932_v45 = vperm.slane %v1329_v53, 0  ;;  %v1259_v50 = vsel %vm4777_vm5, %v1257_v47, 16  ;;  %v4936_v2 = vperm.slane %v1330_v8, 0 }
 0x177   : > { %v1346_v13 = vperm.slane %v4885_v49, 0  ;;  %v4939_v28 = vperm.slane %v1331_v63, 0  ;;  %v1260_v24 = vrot.slane %v1258_v58, 1  ;;  %v4941_v46 = vperm.slane %v1332_v31, 0 }
 0x178   : > { %v4943_v35 = vperm.slane %v1333_v17, 0  ;;  %v4945_v26 = vperm.slane %v1334_v62, 0  ;;  %v1261_v29 = vrot.slane %v1258_v58, 2  ;;  %v1262_v56 = vrot.slane %v1258_v58, 3 }
 0x179   : > { %v1263_v52 = vrot.slane %v1258_v58, 4  ;;  %v1264_v54 = vrot.slane %v1258_v58, 5  ;;  %v1265_v43 = vrot.slane %v1258_v58, 6  ;;  %v1266_v3 = vrot.slane %v1258_v58, 7 }
 0x17a   : > { %v1267_v27 = vrot.slane %v1259_v50, 1  ;;  %v4947_v55 = vperm.slane %v1335_v0, 0  ;;  %v1268_v34 = vrot.slane %v1259_v50, 2  ;;  %v1269_v7 = vrot.slane %v1259_v50, 3 }
 0x17b   : > { %v1270_v9 = vrot.slane %v1259_v50, 4  ;;  %v1271_v10 = vrot.slane %v1259_v50, 5  ;;  %v1272_v14 = vrot.slane %v1259_v50, 6  ;;  %v1273_v32 = vrot.slane %v1259_v50, 7 }
 0x17c   : > { %v1274_v11 = vperm.slane %v1258_v58, 0  ;;  %v1275_v22 = vperm.slane %v1260_v24, 0  ;;  %v1276_v48 = vperm.slane %v1261_v29, 0  ;;  %v4949_v25 = vperm.slane %v1262_v56, 0 }
 0x17d   : > { %v4951_v37 = vperm.slane %v1263_v52, 0  ;;  %v4953_v6 = vperm.slane %v1264_v54, 0  ;;  %v4955_v19 = vperm.slane %v1265_v43, 0  ;;  %v4957_v59 = vperm.slane %v1266_v3, 0 }
 0x17e   : > { %v1282_v23 = vperm.slane %v1259_v50, 0  ;;  %v1283_v51 = vperm.slane %v1267_v27, 0  ;;  %v1284_v36 = vperm.slane %v1268_v34, 0  ;;  %v1285_v44 = vperm.slane %v1269_v7, 0 }
 0x17f   : > { %v4959_v40 = vperm.slane %v1270_v9, 0  ;;  %v4961_v41 = vperm.slane %v1271_v10, 0  ;;  %v4963_v18 = vperm.slane %v1272_v14, 0  ;;  %v4965_v53 = vperm.slane %v1273_v32, 0 }
 0x180   : > { %vm4968_vm10 = vcmp.eq.s32.totalorder %v1274_v11, %v6508_v30  ;;  %vm4973_vm5 = vcmp.eq.s32.totalorder %v1274_v11, %v6472_v5  ;;  %vm1292_vm13 = vcmp.eq.s32.totalorder %v1275_v22, %v6508_v30  ;;  %vm1293_vm2 = vcmp.eq.s32.totalorder %v1275_v22, %v6472_v5 }
 0x181   : > { %vm4990_vm14 = vcmp.eq.s32.totalorder %v1282_v23, %v6508_v30  ;;  %vm4995_vm15 = vcmp.eq.s32.totalorder %v1282_v23, %v6472_v5  ;;  %vm1308_vm11 = vcmp.eq.s32.totalorder %v1283_v51, %v6508_v30  ;;  %vm1309_vm0 = vcmp.eq.s32.totalorder %v1283_v51, %v6472_v5 }
 0x182   : > { %vm1311_vm3 = vcmp.eq.s32.totalorder %v1284_v36, %v6472_v5  ;;  %vm1315_vm6 = vcmp.eq.s32.totalorder %v4959_v40, %v6472_v5  ;;  %vm1316_vm12 = vcmp.eq.s32.totalorder %v4961_v41, %v6508_v30  ;;  %vm1317_vm4 = vcmp.eq.s32.totalorder %v4961_v41, %v6472_v5 }
 0x183   : > { %vm1302_vm7 = vcmp.eq.s32.totalorder %v4955_v19, %v6508_v30  ;;  %vm1303_vm8 = vcmp.eq.s32.totalorder %v4955_v19, %v6472_v5  ;;  %vm1318_vm9 = vcmp.eq.s32.totalorder %v4963_v18, %v6508_v30  ;;  %vm1319_vm1 = vcmp.eq.s32.totalorder %v4963_v18, %v6472_v5 }
 0x184   : > { %v1370_v17 = vsel %vm4968_vm10, %v1338_v60, 0.0  ;;  %v1371_v62 = vsel %vm4973_vm5, %v1338_v60, 0.0  ;;  %v1372_v0 = vsel %vm1292_vm13, %v4922_v42, 0.0  ;;  %v1373_v58 = vsel %vm1293_vm2, %v4922_v42, 0.0 }
 0x185   : > { %v1386_v50 = vsel %vm4990_vm14, %v1346_v13, 0.0  ;;  %v1387_v20 = vsel %vm4995_vm15, %v1346_v13, 0.0  ;;  %v1388_v60 = vsel %vm1308_vm11, %v4939_v28, 0.0  ;;  %v1389_v24 = vsel %vm1309_vm0, %v4939_v28, 0.0 }
 0x186   : > { %vm1304_vm10 = vcmp.eq.s32.totalorder %v4957_v59, %v6508_v30  ;;  %vm1305_vm5 = vcmp.eq.s32.totalorder %v4957_v59, %v6472_v5  ;;  %vm1320_vm13 = vcmp.eq.s32.totalorder %v4965_v53, %v6508_v30  ;;  %vm1321_vm2 = vcmp.eq.s32.totalorder %v4965_v53, %v6472_v5 }
 0x187   : > { %v1352_v42 = vperm.slane %v1336_v61, 0  ;;  %v1353_v13 = vperm.slane %v1337_v12, 0  ;;  %vm6604_vm14 = vcmp.eq.s32.totalorder %v1276_v48, %v6508_v30  ;;  %vm6605_vm15 = vcmp.eq.s32.totalorder %v1276_v48, %v6472_v5 }
 0x188   : > { %v1374_v28 = vsel %vm6604_vm14, %v4924_v21, 0.0  ;;  %v1375_v29 = vsel %vm6605_vm15, %v4924_v21, 0.0  ;;  %vm6606_vm11 = vcmp.eq.s32.totalorder %v1284_v36, %v6508_v30  ;;  %v1391_v52 = vsel %vm1311_vm3, %v4941_v46, 0.0 }
 0x189   : > { %v1390_v56 = vsel %vm6606_vm11, %v4941_v46, 0.0  ;;  %v1402_v61 = vadd.f32 %v1372_v0, %v1370_v17  ;;  %v1409_v54 = vadd.f32 %v1373_v58, %v1371_v62  ;;  %v1416_v49 = vadd.f32 %v1388_v60, %v1386_v50 }
 0x18a   : > { %v1423_v12 = vadd.f32 %v1389_v24, %v1387_v20  ;;  %vm6607_vm0 = vcmp.eq.s32.totalorder %v4949_v25, %v6508_v30  ;;  %vm6608_vm14 = vcmp.eq.s32.totalorder %v4949_v25, %v6472_v5  ;;  %vm6609_vm15 = vcmp.eq.s32.totalorder %v1285_v44, %v6508_v30 }
 0x18b   : > { %v1376_v43 = vsel %vm6607_vm0, %v4926_v39, 0.0  ;;  %v1377_v21 = vsel %vm6608_vm14, %v4926_v39, 0.0  ;;  %v1392_v3 = vsel %vm6609_vm15, %v4943_v35, 0.0  ;;  %vm6610_vm3 = vcmp.eq.s32.totalorder %v1285_v44, %v6472_v5 }
 0x18c   : > { %v1393_v46 = vsel %vm6610_vm3, %v4943_v35, 0.0  ;;  %v1403_v27 = vadd.f32 %v1402_v61, %v1374_v28  ;;  %v1410_v34 = vadd.f32 %v1409_v54, %v1375_v29  ;;  %v1417_v7 = vadd.f32 %v1416_v49, %v1390_v56 }
 0x18d   : > { %v1424_v9 = vadd.f32 %v1423_v12, %v1391_v52  ;;  %vm6611_vm11 = vcmp.eq.s32.totalorder %v4951_v37, %v6508_v30  ;;  %vm6612_vm0 = vcmp.eq.s32.totalorder %v4951_v37, %v6472_v5  ;;  %vm6613_vm14 = vcmp.eq.s32.totalorder %v4959_v40, %v6508_v30 }
 0x18e   : > { %v1378_v10 = vsel %vm6611_vm11, %v4928_v57, 0.0  ;;  %v1379_v39 = vsel %vm6612_vm0, %v4928_v57, 0.0  ;;  %v1394_v14 = vsel %vm6613_vm14, %v4945_v26, 0.0  ;;  %v1395_v35 = vsel %vm1315_vm6, %v4945_v26, 0.0 }
 0x18f   : > { %v1404_v32 = vadd.f32 %v1403_v27, %v1376_v43  ;;  %v1411_v11 = vadd.f32 %v1410_v34, %v1377_v21  ;;  %v1418_v22 = vadd.f32 %v1417_v7, %v1392_v3  ;;  %v1425_v48 = vadd.f32 %v1424_v9, %v1393_v46 }
 0x190   : > { %vm6614_vm15 = vcmp.eq.s32.totalorder %v4953_v6, %v6508_v30  ;;  %vm6615_vm3 = vcmp.eq.s32.totalorder %v4953_v6, %v6472_v5  ;;  %v1396_v26 = vsel %vm1316_vm12, %v4947_v55, 0.0  ;;  %v1397_v37 = vsel %vm1317_vm4, %v4947_v55, 0.0 }
 0x191   : > { %v1380_v57 = vsel %vm6614_vm15, %v4930_v1, 0.0  ;;  %v1381_v25 = vsel %vm6615_vm3, %v4930_v1, 0.0  ;;  %v1405_v23 = vadd.f32 %v1404_v32, %v1378_v10  ;;  %v1412_v51 = vadd.f32 %v1411_v11, %v1379_v39 }
 0x192   : > { %v1419_v36 = vadd.f32 %v1418_v22, %v1394_v14  ;;  %v1426_v44 = vadd.f32 %v1425_v48, %v1395_v35  ;;  %v1382_v6 = vsel %vm1302_vm7, %v4932_v45, 0.0  ;;  %v1383_v1 = vsel %vm1303_vm8, %v4932_v45, 0.0 }
 0x193   : > { %v1398_v40 = vsel %vm1318_vm9, %v1352_v42, 0.0  ;;  %v1399_v55 = vsel %vm1319_vm1, %v1352_v42, 0.0  ;;  %v1406_v41 = vadd.f32 %v1405_v23, %v1380_v57  ;;  %v1413_v8 = vadd.f32 %v1412_v51, %v1381_v25 }
 0x194   : > { %v1420_v47 = vadd.f32 %v1419_v36, %v1396_v26  ;;  %v1427_v63 = vadd.f32 %v1426_v44, %v1397_v37  ;;  %v1384_v19 = vsel %vm1304_vm10, %v4936_v2, 0.0  ;;  %v1385_v45 = vsel %vm1305_vm5, %v4936_v2, 0.0 }
 0x195   : > { %v1400_v18 = vsel %vm1320_vm13, %v1353_v13, 0.0  ;;  %v1401_v31 = vsel %vm1321_vm2, %v1353_v13, 0.0  ;;  %v1407_v17 = vadd.f32 %v1406_v41, %v1382_v6  ;;  %v1414_v62 = vadd.f32 %v1413_v8, %v1383_v1 }
 0x196   : > { %v1421_v0 = vadd.f32 %v1420_v47, %v1398_v40  ;;  %v1428_v58 = vadd.f32 %v1427_v63, %v1399_v55  ;;  %v1189_v59 = vadd.f32 %v4902_v38, %v4894_v4 }
 0x197   : > { %v1408_v2 = vadd.f32 %v1407_v17, %v1384_v19  ;;  %v1415_v50 = vadd.f32 %v1414_v62, %v1385_v45 }
 0x198   : > { %v1422_v30 = vadd.f32 %v1421_v0, %v1400_v18  ;;  %v1429_v20 = vadd.f32 %v1428_v58, %v1401_v31 }
 0x199   : > { %v1430_v5 = vadd.f32 %v1408_v2, %v4896_v33  ;;  %v1431_v53 = vadd.f32 %v1415_v50, %v4898_v16 }
 0x19a   : > { %v1432_v60 = vadd.f32 %v1422_v30, %v4900_v15  ;;  %v1433_v24 = vadd.f32 %v1429_v20, %v1189_v59 }
 0x19b   : > { %1434 = vst [vmem:[%s152_s18] sm:$0xff] %v1430_v5 }
 0x19c   : > { %1435 = vst [vmem:[%s152_s18 + $0x8] sm:$0xff] %v1431_v53 }
 0x19d   : > { %1436 = vst [vmem:[%s152_s18 + $0x10] sm:$0xff] %v1432_v60 }
 0x19e   : > { %1437 = vst [vmem:[%s152_s18 + $0x18] sm:$0xff] %v1433_v24 }
 0x19f   : > { %1687 = shalt.err (!%p1684_p4)
}
 0x1a0   : > { %s1735_s6 = smov 128   ;;  %s1736_s11 = smov 8  }
 0x1a1   : > { %1551 = dma.vmem_to_hbm [thread:$0]  (%p1813_p11), %s1453_s19, 512, %s1455_s23, %s1439_s25, %s1735_s6, %s1735_s6, %s1736_s11  }
 0x1a2 PF: > { %s1469_s12 = sand.u32 1, %s1716_s20   ;;  %p6616_p7 = scmp.ge.s32.totalorder %s1728_s1, 2 }
 0x1a3   : > { %s1470_s13 = scalar_lea.sflag [#allocation7], %s1469_s12 }
 0x1a4   : > { %p1558_p5 = pnand %p6616_p7, %p1817_p12 }
 0x1a6   : > { %p1559_p8 = pneg %p1558_p5 }
 0x1a8   : > { %1711 = dma.done.wait (%p1559_p8), %s1470_s13, 512  }
 0x1a9   : > { %1713 = vsyncadd (%p1559_p8), %s1470_s13, 4294966784  ;;  %p29_p10 = scmp.ge.s32.totalorder %s1788_s24, 4   ;;  %s6617_s20 = smov %s1720_s0 }
 0x1aa   : > { %s6618_s0 = smov %s1724_s21  ;;  %s6619_s21 = smov %s1800_s27 }
 0x1ab   : > { %s6620_s1 = smov %s1788_s24  ;;  %31 = sbr.rel (!%p29_p10) target bundleno = 12 (0xc), region = 69 }
 0x1b0   :  { %1476 = vsyncpa [#allocation6], 1 }
 0x1b1   :  { %1478 = vsyncpa [#allocation6 + $0x1], 1 }
 0x1b2   :  { %1479 = vsyncpa [#allocation7], 1 }
 0x1b3   :  { %1481 = vsyncpa [#allocation7 + $0x1], 1 }

</bundles_post_ra>
